<compile_context>
chip_gen: v5e
topology: v5e:2x2
jax: 0.10.0
libtpu: 0.0.40
codegen_flags: <defaults>
</compile_context>

<pallas_src>
import functools

import jax
import jax.numpy as jnp
from jax import lax
from jax.experimental import pallas as pl
from jax.experimental.pallas import tpu as pltpu


BN_EPS = 1e-5


def _round_up(x, m):
    return (x + m - 1) // m * m


# -----------------------------------------------------------------------------
# Pallas kernel: fused (patches @ W) + bias -> activation.
# BN scale already folded into W; operands bf16, accumulation f32.
# -----------------------------------------------------------------------------
def _fused_matmul_kernel(x_ref, w_ref, b_ref, o_ref, *, act):
    acc = jnp.dot(x_ref[...], w_ref[...], preferred_element_type=jnp.float32)
    y = acc + b_ref[...]
    if act == "relu":
        y = jnp.maximum(y, 0.0)
    elif act == "tanh":
        y = jnp.tanh(y)
    o_ref[...] = y.astype(o_ref.dtype)


def _choose_tm(m):
    # Single block for small M; otherwise >=2 grid steps (v7x megacore),
    # capped at 512 rows (BlockSpec pipelining sweet spot).
    if m <= 256:
        return _round_up(m, 8)
    return min(512, _round_up(m // 2, 8))


def fused_matmul_bias_act(patches, w_p, b_p, act, out_dtype):
    """patches: (M, K) bf16; w_p: (K, Np) bf16; b_p: (1, Np) f32."""
    m, kd = patches.shape
    _, np_ = w_p.shape
    tm = _choose_tm(m)
    mp = _round_up(m, tm)
    if mp != m:
        patches = jnp.pad(patches, ((0, mp - m), (0, 0)))

    out = pl.pallas_call(
        functools.partial(_fused_matmul_kernel, act=act),
        out_shape=jax.ShapeDtypeStruct((mp, np_), out_dtype),
        grid_spec=pltpu.PrefetchScalarGridSpec(
            num_scalar_prefetch=0,
            grid=(mp // tm,),
            in_specs=[
                pl.BlockSpec((tm, kd), lambda i: (i, 0)),
                pl.BlockSpec((kd, np_), lambda i: (0, 0)),
                pl.BlockSpec((1, np_), lambda i: (0, 0)),
            ],
            out_specs=pl.BlockSpec((tm, np_), lambda i: (i, 0)),
        ),
        compiler_params=pltpu.CompilerParams(
            dimension_semantics=("parallel",)),
    )(patches, w_p, b_p)
    return out[:m] if mp != m else out


# -----------------------------------------------------------------------------
# Sub-pixel decomposition of ConvTranspose2d(k=4, stride=2, padding=1).
# Output pixel (2m+rh, 2q+rw) only sees a 2x2 neighbourhood of the input; over
# the 1-padded input this is a 3x3 window with a fixed tap->(parity, offset)
# map, so all 4 phases share one im2col and one matmul of shape
# (N*H*W, 9*Cin) x (9*Cin, 4*Cout).
# -----------------------------------------------------------------------------
# tap kh -> (output parity r, 3x3-window offset d)
_TAP_MAP = {3: (0, 0), 1: (0, 1), 2: (1, 1), 0: (1, 2)}


def _subpixel_weight(w_pt):
    """(Cin, Cout, 4, 4) ConvTranspose2d weight -> (9*Cin, 4*Cout) matrix."""
    cin, cout = w_pt.shape[:2]
    w_big = jnp.zeros((3, 3, cin, 2, 2, cout), jnp.float32)
    for kh in range(4):
        rh, dh = _TAP_MAP[kh]
        for kw in range(4):
            rw, dw = _TAP_MAP[kw]
            w_big = w_big.at[dh, dw, :, rh, rw, :].set(w_pt[:, :, kh, kw])
    # rows ordered (dh, dw, cin); cols ordered (rh, rw, cout)
    return w_big.reshape(9 * cin, 4 * cout)


def _subpixel_patches(x):
    """NHWC -> (N*H*W, 9*C) patches over a 3x3 window of the 1-padded input."""
    n, h, w, c = x.shape
    xp = jnp.pad(x, ((0, 0), (1, 1), (1, 1), (0, 0)))
    cols = [xp[:, dh:dh + h, dw:dw + w, :]
            for dh in range(3) for dw in range(3)]
    return jnp.concatenate(cols, axis=-1).reshape(n * h * w, 9 * c)


# -----------------------------------------------------------------------------
# Layer preparation (done once at init): fold BN scale into the weight matrix,
# pad K/N to lane multiples, cast to bf16.
# -----------------------------------------------------------------------------
def _prepare_layer(w_pt, scale, bias, stride, padding, act):
    cin, cout, k, _ = w_pt.shape
    if stride == 1 and padding == 0:
        # dense path (1x1 spatial input): columns ordered (kh, kw, cout)
        w_mat = jnp.transpose(w_pt, (0, 2, 3, 1)).reshape(cin, k * k * cout)
        reps = k * k
        kind = "dense"
        kp = _round_up(w_mat.shape[0], 128)   # pad the tiny dense K once
    elif stride == 2 and padding == 1 and k == 4:
        w_mat = _subpixel_weight(w_pt)
        reps = 4
        kind = "subpixel"
        kp = w_mat.shape[0]
    else:
        raise NotImplementedError("unsupported deconv geometry")

    col_scale = jnp.tile(scale, (reps,))
    col_bias = jnp.tile(bias, (reps,))
    kd, nc = w_mat.shape
    np_ = _round_up(nc, 128)
    w_p = (jnp.zeros((kp, np_), jnp.float32)
           .at[:kd, :nc].set(w_mat * col_scale[None, :])
           .astype(jnp.bfloat16))
    b_p = jnp.zeros((1, np_), jnp.float32).at[0, :nc].set(col_bias)
    return dict(kind=kind, w_p=w_p, b_p=b_p, cout=cout, k=k, act=act)


def init_generator_params(key, nz, ngf, nc):
    # (cin, cout, k, stride, pad, act, has_bn)
    cfg = [
        (nz,      ngf * 8, 4, 1, 0, "relu", True),
        (ngf * 8, ngf * 4, 4, 2, 1, "relu", True),
        (ngf * 4, ngf * 2, 4, 2, 1, "relu", True),
        (ngf * 2, ngf * 1, 4, 2, 1, "relu", True),
        (ngf * 1, nc,      4, 2, 1, "tanh", False),
    ]
    params = []
    for (cin, cout, k, s, p, act, has_bn) in cfg:
        key, kw_, kg, kb = jax.random.split(key, 4)
        w = 0.02 * jax.random.normal(kw_, (cin, cout, k, k), jnp.float32)
        if has_bn:
            gamma = 1.0 + 0.1 * jax.random.normal(kg, (cout,), jnp.float32)
            beta = 0.1 * jax.random.normal(kb, (cout,), jnp.float32)
            running_mean = jnp.zeros((cout,), jnp.float32)
            running_var = jnp.ones((cout,), jnp.float32)
            scale = gamma / jnp.sqrt(running_var + BN_EPS)
            bias = beta - running_mean * scale
        else:
            scale = jnp.ones((cout,), jnp.float32)
            bias = jnp.zeros((cout,), jnp.float32)
        layer = dict(w=w, scale=scale, bias=bias, stride=s, pad=p, act=act)
        layer.update(_prepare_layer(w, scale, bias, s, p, act))
        params.append(layer)
    return params


# -----------------------------------------------------------------------------
# Generator forward (Pallas path, NHWC + bf16 between layers)
# -----------------------------------------------------------------------------
def generator_forward(params, x_nchw):
    x = jnp.transpose(x_nchw, (0, 2, 3, 1)).astype(jnp.bfloat16)   # -> NHWC
    for idx, layer in enumerate(params):
        out_dtype = jnp.float32 if idx == len(params) - 1 else jnp.bfloat16
        if layer["kind"] == "dense":
            n = x.shape[0]
            p2d = x.reshape(n, -1)
            kp = layer["w_p"].shape[0]
            if p2d.shape[1] != kp:
                p2d = jnp.pad(p2d, ((0, 0), (0, kp - p2d.shape[1])))
            out2d = fused_matmul_bias_act(p2d, layer["w_p"], layer["b_p"],
                                          layer["act"], out_dtype)
            cout, k = layer["cout"], layer["k"]
            x = out2d[:, :k * k * cout].reshape(n, k, k, cout)
        else:  # sub-pixel stride-2 deconv
            n, h, w, _ = x.shape
            p2d = _subpixel_patches(x)
            out2d = fused_matmul_bias_act(p2d, layer["w_p"], layer["b_p"],
                                          layer["act"], out_dtype)
            cout = layer["cout"]
            x = (out2d[:, :4 * cout]
                 .reshape(n, h, w, 2, 2, cout)
                 .transpose(0, 1, 3, 2, 4, 5)
                 .reshape(n, 2 * h, 2 * w, cout))
    return jnp.transpose(x, (0, 3, 1, 2))                           # -> NCHW


# Pure-JAX f32 reference (XLA dilated conv) for correctness checking.
def generator_forward_ref(params, x_nchw):
    x = x_nchw
    for layer in params:
        w_pt, s, p, act = layer["w"], layer["stride"], layer["pad"], layer["act"]
        k = w_pt.shape[2]
        rhs = jnp.flip(jnp.transpose(w_pt, (1, 0, 2, 3)), (2, 3))  # (Cout,Cin,K,K)
        x = lax.conv_general_dilated(
            x, rhs, window_strides=(1, 1),
            padding=[(k - 1 - p, k - 1 - p)] * 2,
            lhs_dilation=(s, s),
            dimension_numbers=("NCHW", "OIHW", "NCHW"))
        x = x * layer["scale"][None, :, None, None] + layer["bias"][None, :, None, None]
        if act == "relu":
            x = jnp.maximum(x, 0.0)
        elif act == "tanh":
            x = jnp.tanh(x)
    return x


if __name__ == "__main__":
    # Small DCGAN config: nz=8, ngf=8, nc=3, batch=2 -> output (2, 3, 64, 64)
    nz, ngf, nc, batch = 8, 8, 3, 2

    key = jax.random.PRNGKey(0)
    kx, kparam = jax.random.split(key)
    params = init_generator_params(kparam, nz, ngf, nc)
    x = jax.random.normal(kx, (batch, nz, 1, 1), jnp.float32)

    fwd = jax.jit(lambda v: generator_forward(params, v))
    out = jax.block_until_ready(fwd(x))
    assert out.shape == (batch, nc, 64, 64), out.shape

    ref = jax.block_until_ready(generator_forward_ref(params, x))
    max_err = float(jnp.max(jnp.abs(out - ref)))
    assert max_err < 2e-2, f"mismatch vs reference: {max_err}"

    print("KERNEL_OK")
</pallas_src>

<mosaic_0001>
module attributes {stable_mosaic.version = 11 : i64} {
  func.func @_fused_matmul_kernel(%arg0: i32, %arg1: memref<8x128xbf16, #tpu.memory_space<vmem>>, %arg2: memref<128x1024xbf16, #tpu.memory_space<vmem>>, %arg3: memref<1x1024xf32, #tpu.memory_space<vmem>>, %arg4: memref<8x1024xbf16, #tpu.memory_space<vmem>>) attributes {dimension_semantics = [#tpu.dimension_semantics<parallel>], iteration_bounds = array<i64: 1>, scalar_prefetch = 0 : i64, scratch_operands = 0 : i64, tpu.core_type = #tpu.core_type<tc>, window_params = [{transform_indices = @transform_0, window_bounds = array<i64: 8, 128>}, {pipeline_mode = #tpu.pipeline_mode<synchronous>, transform_indices = @transform_1, window_bounds = array<i64: 128, 1024>}, {pipeline_mode = #tpu.pipeline_mode<synchronous>, transform_indices = @transform_2, window_bounds = array<i64: 1, 1024>}, {transform_indices = @transform_3, window_bounds = array<i64: 8, 1024>}]} {
    %c0 = arith.constant 0 : index
    %c0_0 = arith.constant 0 : index
    %0 = vector.load %arg1[%c0, %c0_0] : memref<8x128xbf16, #tpu.memory_space<vmem>>, vector<8x128xbf16>
    %c0_1 = arith.constant 0 : index
    %c0_2 = arith.constant 0 : index
    %1 = vector.load %arg2[%c0_1, %c0_2] : memref<128x1024xbf16, #tpu.memory_space<vmem>>, vector<128x1024xbf16>
    %cst = arith.constant dense<0.000000e+00> : vector<8x1024xf32>
    %2 = tpu.matmul %0, %1, %cst {dimension_numbers = #tpu.dot_dimension_numbers<[1], [0], [0], [1], [0, 0, 1, 1], [], []>} : vector<8x128xbf16>, vector<128x1024xbf16>, vector<8x1024xf32> -> vector<8x1024xf32>
    %c0_3 = arith.constant 0 : index
    %c0_4 = arith.constant 0 : index
    %3 = vector.load %arg3[%c0_3, %c0_4] : memref<1x1024xf32, #tpu.memory_space<vmem>>, vector<1x1024xf32>
    %4 = vector.broadcast %3 : vector<1x1024xf32> to vector<8x1024xf32>
    %5 = arith.addf %2, %4 : vector<8x1024xf32>
    %cst_5 = arith.constant 0.000000e+00 : f32
    %6 = vector.broadcast %cst_5 : f32 to vector<8x1024xf32>
    %7 = arith.maximumf %5, %6 : vector<8x1024xf32>
    %8 = arith.truncf %7 : vector<8x1024xf32> to vector<8x1024xbf16>
    %c0_6 = arith.constant 0 : index
    %c0_7 = arith.constant 0 : index
    %9 = vector.load %arg4[%c0_6, %c0_7] : memref<8x1024xbf16, #tpu.memory_space<vmem>>, vector<8x1024xbf16>
    tpu.vector_store %arg4[%c0_6, %c0_7], %8 {strides = array<i32>} : memref<8x1024xbf16, #tpu.memory_space<vmem>>, vector<8x1024xbf16>,
    return
  }
  func.func @transform_0(%arg0: i32) -> (i32, i32) {
    %c0_i32 = arith.constant 0 : i32
    %c0_i32_0 = arith.constant 0 : i32
    return %arg0, %c0_i32 : i32, i32
  }
  func.func @transform_1(%arg0: i32) -> (i32, i32) {
    %c0_i32 = arith.constant 0 : i32
    %c0_i32_0 = arith.constant 0 : i32
    %c0_i32_1 = arith.constant 0 : i32
    return %c0_i32, %c0_i32_0 : i32, i32
  }
  func.func @transform_2(%arg0: i32) -> (i32, i32) {
    %c0_i32 = arith.constant 0 : i32
    %c0_i32_0 = arith.constant 0 : i32
    %c0_i32_1 = arith.constant 0 : i32
    return %c0_i32, %c0_i32_0 : i32, i32
  }
  func.func @transform_3(%arg0: i32) -> (i32, i32) {
    %c0_i32 = arith.constant 0 : i32
    %c0_i32_0 = arith.constant 0 : i32
    return %arg0, %c0_i32 : i32, i32
  }
}

module attributes {stable_mosaic.version = 11 : i64} {
  func.func @_fused_matmul_kernel(%arg0: i32, %arg1: memref<32x576xbf16, #tpu.memory_space<vmem>>, %arg2: memref<576x128xbf16, #tpu.memory_space<vmem>>, %arg3: memref<1x128xf32, #tpu.memory_space<vmem>>, %arg4: memref<32x128xbf16, #tpu.memory_space<vmem>>) attributes {dimension_semantics = [#tpu.dimension_semantics<parallel>], iteration_bounds = array<i64: 1>, scalar_prefetch = 0 : i64, scratch_operands = 0 : i64, tpu.core_type = #tpu.core_type<tc>, window_params = [{transform_indices = @transform_0, window_bounds = array<i64: 32, 576>}, {pipeline_mode = #tpu.pipeline_mode<synchronous>, transform_indices = @transform_1, window_bounds = array<i64: 576, 128>}, {pipeline_mode = #tpu.pipeline_mode<synchronous>, transform_indices = @transform_2, window_bounds = array<i64: 1, 128>}, {transform_indices = @transform_3, window_bounds = array<i64: 32, 128>}]} {
    %c0 = arith.constant 0 : index
    %c0_0 = arith.constant 0 : index
    %0 = vector.load %arg1[%c0, %c0_0] : memref<32x576xbf16, #tpu.memory_space<vmem>>, vector<32x576xbf16>
    %c0_1 = arith.constant 0 : index
    %c0_2 = arith.constant 0 : index
    %1 = vector.load %arg2[%c0_1, %c0_2] : memref<576x128xbf16, #tpu.memory_space<vmem>>, vector<576x128xbf16>
    %cst = arith.constant dense<0.000000e+00> : vector<32x128xf32>
    %2 = tpu.matmul %0, %1, %cst {dimension_numbers = #tpu.dot_dimension_numbers<[1], [0], [0], [1], [0, 0, 1, 1], [], []>} : vector<32x576xbf16>, vector<576x128xbf16>, vector<32x128xf32> -> vector<32x128xf32>
    %c0_3 = arith.constant 0 : index
    %c0_4 = arith.constant 0 : index
    %3 = vector.load %arg3[%c0_3, %c0_4] : memref<1x128xf32, #tpu.memory_space<vmem>>, vector<1x128xf32>
    %4 = vector.broadcast %3 : vector<1x128xf32> to vector<32x128xf32>
    %5 = arith.addf %2, %4 : vector<32x128xf32>
    %cst_5 = arith.constant 0.000000e+00 : f32
    %6 = vector.broadcast %cst_5 : f32 to vector<32x128xf32>
    %7 = arith.maximumf %5, %6 : vector<32x128xf32>
    %8 = arith.truncf %7 : vector<32x128xf32> to vector<32x128xbf16>
    %c0_6 = arith.constant 0 : index
    %c0_7 = arith.constant 0 : index
    %9 = vector.load %arg4[%c0_6, %c0_7] : memref<32x128xbf16, #tpu.memory_space<vmem>>, vector<32x128xbf16>
    tpu.vector_store %arg4[%c0_6, %c0_7], %8 {strides = array<i32>} : memref<32x128xbf16, #tpu.memory_space<vmem>>, vector<32x128xbf16>,
    return
  }
  func.func @transform_0(%arg0: i32) -> (i32, i32) {
    %c0_i32 = arith.constant 0 : i32
    %c0_i32_0 = arith.constant 0 : i32
    return %arg0, %c0_i32 : i32, i32
  }
  func.func @transform_1(%arg0: i32) -> (i32, i32) {
    %c0_i32 = arith.constant 0 : i32
    %c0_i32_0 = arith.constant 0 : i32
    %c0_i32_1 = arith.constant 0 : i32
    return %c0_i32, %c0_i32_0 : i32, i32
  }
  func.func @transform_2(%arg0: i32) -> (i32, i32) {
    %c0_i32 = arith.constant 0 : i32
    %c0_i32_0 = arith.constant 0 : i32
    %c0_i32_1 = arith.constant 0 : i32
    return %c0_i32, %c0_i32_0 : i32, i32
  }
  func.func @transform_3(%arg0: i32) -> (i32, i32) {
    %c0_i32 = arith.constant 0 : i32
    %c0_i32_0 = arith.constant 0 : i32
    return %arg0, %c0_i32 : i32, i32
  }
}

module attributes {stable_mosaic.version = 11 : i64} {
  func.func @_fused_matmul_kernel(%arg0: i32, %arg1: memref<128x288xbf16, #tpu.memory_space<vmem>>, %arg2: memref<288x128xbf16, #tpu.memory_space<vmem>>, %arg3: memref<1x128xf32, #tpu.memory_space<vmem>>, %arg4: memref<128x128xbf16, #tpu.memory_space<vmem>>) attributes {dimension_semantics = [#tpu.dimension_semantics<parallel>], iteration_bounds = array<i64: 1>, scalar_prefetch = 0 : i64, scratch_operands = 0 : i64, tpu.core_type = #tpu.core_type<tc>, window_params = [{transform_indices = @transform_0, window_bounds = array<i64: 128, 288>}, {pipeline_mode = #tpu.pipeline_mode<synchronous>, transform_indices = @transform_1, window_bounds = array<i64: 288, 128>}, {pipeline_mode = #tpu.pipeline_mode<synchronous>, transform_indices = @transform_2, window_bounds = array<i64: 1, 128>}, {transform_indices = @transform_3, window_bounds = array<i64: 128, 128>}]} {
    %c0 = arith.constant 0 : index
    %c0_0 = arith.constant 0 : index
    %0 = vector.load %arg1[%c0, %c0_0] : memref<128x288xbf16, #tpu.memory_space<vmem>>, vector<128x288xbf16>
    %c0_1 = arith.constant 0 : index
    %c0_2 = arith.constant 0 : index
    %1 = vector.load %arg2[%c0_1, %c0_2] : memref<288x128xbf16, #tpu.memory_space<vmem>>, vector<288x128xbf16>
    %cst = arith.constant dense<0.000000e+00> : vector<128x128xf32>
    %2 = tpu.matmul %0, %1, %cst {dimension_numbers = #tpu.dot_dimension_numbers<[1], [0], [0], [1], [0, 0, 1, 1], [], []>} : vector<128x288xbf16>, vector<288x128xbf16>, vector<128x128xf32> -> vector<128x128xf32>
    %c0_3 = arith.constant 0 : index
    %c0_4 = arith.constant 0 : index
    %3 = vector.load %arg3[%c0_3, %c0_4] : memref<1x128xf32, #tpu.memory_space<vmem>>, vector<1x128xf32>
    %4 = vector.broadcast %3 : vector<1x128xf32> to vector<128x128xf32>
    %5 = arith.addf %2, %4 : vector<128x128xf32>
    %cst_5 = arith.constant 0.000000e+00 : f32
    %6 = vector.broadcast %cst_5 : f32 to vector<128x128xf32>
    %7 = arith.maximumf %5, %6 : vector<128x128xf32>
    %8 = arith.truncf %7 : vector<128x128xf32> to vector<128x128xbf16>
    %c0_6 = arith.constant 0 : index
    %c0_7 = arith.constant 0 : index
    %9 = vector.load %arg4[%c0_6, %c0_7] : memref<128x128xbf16, #tpu.memory_space<vmem>>, vector<128x128xbf16>
    tpu.vector_store %arg4[%c0_6, %c0_7], %8 {strides = array<i32>} : memref<128x128xbf16, #tpu.memory_space<vmem>>, vector<128x128xbf16>,
    return
  }
  func.func @transform_0(%arg0: i32) -> (i32, i32) {
    %c0_i32 = arith.constant 0 : i32
    %c0_i32_0 = arith.constant 0 : i32
    return %arg0, %c0_i32 : i32, i32
  }
  func.func @transform_1(%arg0: i32) -> (i32, i32) {
    %c0_i32 = arith.constant 0 : i32
    %c0_i32_0 = arith.constant 0 : i32
    %c0_i32_1 = arith.constant 0 : i32
    return %c0_i32, %c0_i32_0 : i32, i32
  }
  func.func @transform_2(%arg0: i32) -> (i32, i32) {
    %c0_i32 = arith.constant 0 : i32
    %c0_i32_0 = arith.constant 0 : i32
    %c0_i32_1 = arith.constant 0 : i32
    return %c0_i32, %c0_i32_0 : i32, i32
  }
  func.func @transform_3(%arg0: i32) -> (i32, i32) {
    %c0_i32 = arith.constant 0 : i32
    %c0_i32_0 = arith.constant 0 : i32
    return %arg0, %c0_i32 : i32, i32
  }
}

module attributes {stable_mosaic.version = 11 : i64} {
  func.func @_fused_matmul_kernel(%arg0: i32, %arg1: memref<256x144xbf16, #tpu.memory_space<vmem>>, %arg2: memref<144x128xbf16, #tpu.memory_space<vmem>>, %arg3: memref<1x128xf32, #tpu.memory_space<vmem>>, %arg4: memref<256x128xbf16, #tpu.memory_space<vmem>>) attributes {dimension_semantics = [#tpu.dimension_semantics<parallel>], iteration_bounds = array<i64: 2>, scalar_prefetch = 0 : i64, scratch_operands = 0 : i64, tpu.core_type = #tpu.core_type<tc>, window_params = [{transform_indices = @transform_0, window_bounds = array<i64: 256, 144>}, {pipeline_mode = #tpu.pipeline_mode<synchronous>, transform_indices = @transform_1, window_bounds = array<i64: 144, 128>}, {pipeline_mode = #tpu.pipeline_mode<synchronous>, transform_indices = @transform_2, window_bounds = array<i64: 1, 128>}, {transform_indices = @transform_3, window_bounds = array<i64: 256, 128>}]} {
    %c0 = arith.constant 0 : index
    %c0_0 = arith.constant 0 : index
    %0 = vector.load %arg1[%c0, %c0_0] : memref<256x144xbf16, #tpu.memory_space<vmem>>, vector<256x144xbf16>
    %c0_1 = arith.constant 0 : index
    %c0_2 = arith.constant 0 : index
    %1 = vector.load %arg2[%c0_1, %c0_2] : memref<144x128xbf16, #tpu.memory_space<vmem>>, vector<144x128xbf16>
    %cst = arith.constant dense<0.000000e+00> : vector<256x128xf32>
    %2 = tpu.matmul %0, %1, %cst {dimension_numbers = #tpu.dot_dimension_numbers<[1], [0], [0], [1], [0, 0, 1, 1], [], []>} : vector<256x144xbf16>, vector<144x128xbf16>, vector<256x128xf32> -> vector<256x128xf32>
    %c0_3 = arith.constant 0 : index
    %c0_4 = arith.constant 0 : index
    %3 = vector.load %arg3[%c0_3, %c0_4] : memref<1x128xf32, #tpu.memory_space<vmem>>, vector<1x128xf32>
    %4 = vector.broadcast %3 : vector<1x128xf32> to vector<256x128xf32>
    %5 = arith.addf %2, %4 : vector<256x128xf32>
    %cst_5 = arith.constant 0.000000e+00 : f32
    %6 = vector.broadcast %cst_5 : f32 to vector<256x128xf32>
    %7 = arith.maximumf %5, %6 : vector<256x128xf32>
    %8 = arith.truncf %7 : vector<256x128xf32> to vector<256x128xbf16>
    %c0_6 = arith.constant 0 : index
    %c0_7 = arith.constant 0 : index
    %9 = vector.load %arg4[%c0_6, %c0_7] : memref<256x128xbf16, #tpu.memory_space<vmem>>, vector<256x128xbf16>
    tpu.vector_store %arg4[%c0_6, %c0_7], %8 {strides = array<i32>} : memref<256x128xbf16, #tpu.memory_space<vmem>>, vector<256x128xbf16>,
    return
  }
  func.func @transform_0(%arg0: i32) -> (i32, i32) {
    %c0_i32 = arith.constant 0 : i32
    %c0_i32_0 = arith.constant 0 : i32
    return %arg0, %c0_i32 : i32, i32
  }
  func.func @transform_1(%arg0: i32) -> (i32, i32) {
    %c0_i32 = arith.constant 0 : i32
    %c0_i32_0 = arith.constant 0 : i32
    %c0_i32_1 = arith.constant 0 : i32
    return %c0_i32, %c0_i32_0 : i32, i32
  }
  func.func @transform_2(%arg0: i32) -> (i32, i32) {
    %c0_i32 = arith.constant 0 : i32
    %c0_i32_0 = arith.constant 0 : i32
    %c0_i32_1 = arith.constant 0 : i32
    return %c0_i32, %c0_i32_0 : i32, i32
  }
  func.func @transform_3(%arg0: i32) -> (i32, i32) {
    %c0_i32 = arith.constant 0 : i32
    %c0_i32_0 = arith.constant 0 : i32
    return %arg0, %c0_i32 : i32, i32
  }
}

module attributes {stable_mosaic.version = 11 : i64} {
  func.func @_fused_matmul_kernel(%arg0: i32, %arg1: memref<512x72xbf16, #tpu.memory_space<vmem>>, %arg2: memref<72x128xbf16, #tpu.memory_space<vmem>>, %arg3: memref<1x128xf32, #tpu.memory_space<vmem>>, %arg4: memref<512x128xf32, #tpu.memory_space<vmem>>) attributes {dimension_semantics = [#tpu.dimension_semantics<parallel>], iteration_bounds = array<i64: 4>, scalar_prefetch = 0 : i64, scratch_operands = 0 : i64, tpu.core_type = #tpu.core_type<tc>, window_params = [{transform_indices = @transform_0, window_bounds = array<i64: 512, 72>}, {pipeline_mode = #tpu.pipeline_mode<synchronous>, transform_indices = @transform_1, window_bounds = array<i64: 72, 128>}, {pipeline_mode = #tpu.pipeline_mode<synchronous>, transform_indices = @transform_2, window_bounds = array<i64: 1, 128>}, {transform_indices = @transform_3, window_bounds = array<i64: 512, 128>}]} {
    %c0 = arith.constant 0 : index
    %c0_0 = arith.constant 0 : index
    %0 = vector.load %arg1[%c0, %c0_0] : memref<512x72xbf16, #tpu.memory_space<vmem>>, vector<512x72xbf16>
    %c0_1 = arith.constant 0 : index
    %c0_2 = arith.constant 0 : index
    %1 = vector.load %arg2[%c0_1, %c0_2] : memref<72x128xbf16, #tpu.memory_space<vmem>>, vector<72x128xbf16>
    %cst = arith.constant dense<0.000000e+00> : vector<512x128xf32>
    %2 = tpu.matmul %0, %1, %cst {dimension_numbers = #tpu.dot_dimension_numbers<[1], [0], [0], [1], [0, 0, 1, 1], [], []>} : vector<512x72xbf16>, vector<72x128xbf16>, vector<512x128xf32> -> vector<512x128xf32>
    %c0_3 = arith.constant 0 : index
    %c0_4 = arith.constant 0 : index
    %3 = vector.load %arg3[%c0_3, %c0_4] : memref<1x128xf32, #tpu.memory_space<vmem>>, vector<1x128xf32>
    %4 = vector.broadcast %3 : vector<1x128xf32> to vector<512x128xf32>
    %5 = arith.addf %2, %4 : vector<512x128xf32>
    %6 = math.tanh %5 : vector<512x128xf32>
    %c0_5 = arith.constant 0 : index
    %c0_6 = arith.constant 0 : index
    %7 = vector.load %arg4[%c0_5, %c0_6] : memref<512x128xf32, #tpu.memory_space<vmem>>, vector<512x128xf32>
    tpu.vector_store %arg4[%c0_5, %c0_6], %6 {strides = array<i32>} : memref<512x128xf32, #tpu.memory_space<vmem>>, vector<512x128xf32>,
    return
  }
  func.func @transform_0(%arg0: i32) -> (i32, i32) {
    %c0_i32 = arith.constant 0 : i32
    %c0_i32_0 = arith.constant 0 : i32
    return %arg0, %c0_i32 : i32, i32
  }
  func.func @transform_1(%arg0: i32) -> (i32, i32) {
    %c0_i32 = arith.constant 0 : i32
    %c0_i32_0 = arith.constant 0 : i32
    %c0_i32_1 = arith.constant 0 : i32
    return %c0_i32, %c0_i32_0 : i32, i32
  }
  func.func @transform_2(%arg0: i32) -> (i32, i32) {
    %c0_i32 = arith.constant 0 : i32
    %c0_i32_0 = arith.constant 0 : i32
    %c0_i32_1 = arith.constant 0 : i32
    return %c0_i32, %c0_i32_0 : i32, i32
  }
  func.func @transform_3(%arg0: i32) -> (i32, i32) {
    %c0_i32 = arith.constant 0 : i32
    %c0_i32_0 = arith.constant 0 : i32
    return %arg0, %c0_i32 : i32, i32
  }
}

</mosaic_0001>

<bundles_post_ra>
// kernel: _lambda_.5
= control target key start
LH: loop header
LB: loop body
LE: loop exit
PB: predicated region body
PF: predicated region fallthrough
CT: control target
= control target key end

     0   :  { %8 = vsyncpa [#allocation3], 0  ;;  %s1004_s0 = inlined_call_operand.vmem [shape: bf16[8,128], index: 0, kind: input, shape index: {}]   ;;  %s1005_s1 = inlined_call_operand.hbm [shape: bf16[128,1024], index: 1, kind: input, shape index: {}]   ;;  %s1006_s2 = inlined_call_operand.hbm [shape: f32[1,1024], index: 2, kind: input, shape index: {}]   ;;  %s1007_s3 = inlined_call_operand.vmem [shape: bf16[8,1024], index: 3, kind: output, shape index: {}]  }
   0x1   :  { %s16_s14 = sshll.u32 %s1005_s1, 4  ;;  %s17_s14 = int_to_ptr.hbm [resolvable:$true] %s16_s14 }
   0x2   :  { %9 = vsyncpa [#allocation5], 0  ;;  %s949_s15 = smov [#allocation2]   ;;  %s30_s19 = sshll.u32 %s1006_s2, 4  ;;  %s31_s19 = int_to_ptr.hbm [resolvable:$true] %s30_s19 }
   0x3   :  { %s18_s16 = sshll.u32 %s949_s15, 4  ;;  %s950_s20 = smov 512   ;;  %s19_s16 = int_to_ptr.vmem [resolvable:$true] %s18_s16 }
   0x4   :  { %s951_s21 = smov 32   ;;  %s952_s22 = smov [#allocation4]  }
   0x5   :  { %24 = dma.hbm_to_vmem [thread:$0]  %s17_s14, 8192, %s19_s16, [#allocation3], %s950_s20, %s950_s20, %s951_s21  }
   0x6   :  { %s32_s23 = sshll.u32 %s952_s22, 4  ;;  %s33_s23 = int_to_ptr.vmem [resolvable:$true] %s32_s23 }
   0x7   :  { %35 = dma.hbm_to_vmem [thread:$0]  %s31_s19, 128, %s33_s23, [#allocation5]  }
   0x8   :  { %945 = dma.done.wait [#allocation3], 8192  }
   0x9   :  { %946 = vsyncadd [#allocation3], 4294959104 }
   0xa   :  { %947 = dma.done.wait [#allocation5], 128  }
   0xb   :  { %948 = vsyncadd [#allocation5], 4294967168  ;;  %v799_v0 = vld [vmem:[#allocation2 + $0x1c0] sm:$0xf]  ;;  %v885_v2 = vld [vmem:[#allocation2 + $0x1c4] sm:$0xf] }
   0xc   :  { %v889_v1 = vld [vmem:[#allocation2 + $0x1dc] sm:$0xf0]  ;;  %v801_v4 = vld [vmem:[#allocation2 + $0x1e0] sm:$0xf0]  ;;  %v807_v5 = vld [vmem:[#allocation2 + $0x1c8] sm:$0xf] }
   0xd   :  { %v800_v3 = vor.u32 %v889_v1, %v799_v0  ;;  %v890_v6 = vld [vmem:[#allocation2 + $0x1e4] sm:$0xf0]  ;;  %v804_v7 = vor.u32 %v885_v2, %v801_v4  ;;  %v886_v9 = vld [vmem:[#allocation2 + $0x1cc] sm:$0xf]  ;;  %v767_v11 = vld [vmem:[#allocation2 + $0x180] sm:$0xf] }
   0xe   :  { %v808_v8 = vor.u32 %v890_v6, %v807_v5  ;;  %v809_v10 = vld [vmem:[#allocation2 + $0x1e8] sm:$0xf0]  ;;  %v881_v13 = vld [vmem:[#allocation2 + $0x19c] sm:$0xf0]  ;;  %v877_v14 = vld [vmem:[#allocation2 + $0x184] sm:$0xf] }
   0xf   :  { %447 = vmatpush.bf16.msra.mxu0 %v800_v3  ;;  %v812_v12 = vor.u32 %v886_v9, %v809_v10  ;;  %v769_v15 = vld [vmem:[#allocation2 + $0x1a0] sm:$0xf0]  ;;  %460 = vmatpush.bf16.msra.mxu1 %v804_v7  ;;  %v768_v16 = vor.u32 %v881_v13, %v767_v11  ;;  %v775_v18 = vld [vmem:[#allocation2 + $0x188] sm:$0xf]  ;;  %v878_v20 = vld [vmem:[#allocation2 + $0x18c] sm:$0xf] }
  0x10   :  { %473 = vmatpush.bf16.msra.mxu2 %v808_v8  ;;  %v772_v17 = vor.u32 %v877_v14, %v769_v15  ;;  %v882_v19 = vld [vmem:[#allocation2 + $0x1a4] sm:$0xf0]  ;;  %v777_v22 = vld [vmem:[#allocation2 + $0x1a8] sm:$0xf0]  ;;  %v735_v23 = vld [vmem:[#allocation2 + $0x140] sm:$0xf] }
  0x11   :  { %486 = vmatpush.bf16.msra.mxu3 %v812_v12  ;;  %v776_v21 = vor.u32 %v882_v19, %v775_v18  ;;  %v873_v24 = vld [vmem:[#allocation2 + $0x15c] sm:$0xf0]  ;;  %v780_v25 = vor.u32 %v878_v20, %v777_v22  ;;  %v869_v26 = vld [vmem:[#allocation2 + $0x144] sm:$0xf]  ;;  %v743_v28 = vld [vmem:[#allocation2 + $0x148] sm:$0xf] }
  0x12   :  { %v737_v27 = vld [vmem:[#allocation2 + $0x160] sm:$0xf0]  ;;  %v736_v29 = vor.u32 %v873_v24, %v735_v23  ;;  %v874_v30 = vld [vmem:[#allocation2 + $0x164] sm:$0xf0]  ;;  %v870_v31 = vld [vmem:[#allocation2 + $0x14c] sm:$0xf] }
  0x13   :  { %448 = vmatpush.bf16.msra.mxu0 %v768_v16  ;;  %v745_v32 = vld [vmem:[#allocation2 + $0x168] sm:$0xf0]  ;;  %461 = vmatpush.bf16.msra.mxu1 %v772_v17  ;;  %v740_v33 = vor.u32 %v869_v26, %v737_v27  ;;  %v744_v34 = vor.u32 %v874_v30, %v743_v28  ;;  %v703_v35 = vld [vmem:[#allocation2 + $0x100] sm:$0xf]  ;;  %v861_v37 = vld [vmem:[#allocation2 + $0x104] sm:$0xf] }
  0x14   :  { %474 = vmatpush.bf16.msra.mxu2 %v776_v21  ;;  %v865_v36 = vld [vmem:[#allocation2 + $0x11c] sm:$0xf0]  ;;  %v748_v38 = vor.u32 %v870_v31, %v745_v32  ;;  %v705_v39 = vld [vmem:[#allocation2 + $0x120] sm:$0xf0]  ;;  %v711_v40 = vld [vmem:[#allocation2 + $0x108] sm:$0xf] }
  0x15   :  { %487 = vmatpush.bf16.msra.mxu3 %v780_v25  ;;  %v866_v41 = vld [vmem:[#allocation2 + $0x124] sm:$0xf0]  ;;  %v862_v42 = vld [vmem:[#allocation2 + $0x10c] sm:$0xf]  ;;  %v704_v44 = vor.u32 %v865_v36, %v703_v35  ;;  %v708_v45 = vor.u32 %v861_v37, %v705_v39  ;;  %v671_v47 = vld [vmem:[#allocation2 + $0xc0] sm:$0xf] }
  0x16   :  { %v713_v43 = vld [vmem:[#allocation2 + $0x128] sm:$0xf0]  ;;  %v712_v46 = vor.u32 %v866_v41, %v711_v40  ;;  %v857_v48 = vld [vmem:[#allocation2 + $0xdc] sm:$0xf0]  ;;  %v853_v49 = vld [vmem:[#allocation2 + $0xc4] sm:$0xf] }
  0x17   :  { %449 = vmatpush.bf16.msra.mxu0 %v736_v29  ;;  %462 = vmatpush.bf16.msra.mxu1 %v740_v33  ;;  %v716_v50 = vor.u32 %v862_v42, %v713_v43  ;;  %v673_v51 = vld [vmem:[#allocation2 + $0xe0] sm:$0xf0]  ;;  %v679_v52 = vld [vmem:[#allocation2 + $0xc8] sm:$0xf]  ;;  %v854_v54 = vld [vmem:[#allocation2 + $0xcc] sm:$0xf]  ;;  %v672_v56 = vor.u32 %v857_v48, %v671_v47 }
  0x18   :  { %475 = vmatpush.bf16.msra.mxu2 %v744_v34  ;;  %v858_v53 = vld [vmem:[#allocation2 + $0xe4] sm:$0xf0]  ;;  %v681_v55 = vld [vmem:[#allocation2 + $0xe8] sm:$0xf0]  ;;  %v676_v57 = vor.u32 %v853_v49, %v673_v51  ;;  %v639_v59 = vld [vmem:[#allocation2 + $0x80] sm:$0xf] }
  0x19   :  { %488 = vmatpush.bf16.msra.mxu3 %v748_v38  ;;  %v680_v58 = vor.u32 %v858_v53, %v679_v52  ;;  %v849_v60 = vld [vmem:[#allocation2 + $0x9c] sm:$0xf0]  ;;  %v845_v61 = vld [vmem:[#allocation2 + $0x84] sm:$0xf]  ;;  %v684_v62 = vor.u32 %v854_v54, %v681_v55  ;;  %v647_v0 = vld [vmem:[#allocation2 + $0x88] sm:$0xf] }
  0x1a   :  { %v641_v63 = vld [vmem:[#allocation2 + $0xa0] sm:$0xf0]  ;;  %v850_v1 = vld [vmem:[#allocation2 + $0xa4] sm:$0xf0]  ;;  %v846_v2 = vld [vmem:[#allocation2 + $0x8c] sm:$0xf]  ;;  %v640_v4 = vor.u32 %v849_v60, %v639_v59 }
  0x1b   :  { %450 = vmatpush.bf16.msra.mxu0 %v704_v44  ;;  %463 = vmatpush.bf16.msra.mxu1 %v708_v45  ;;  %v649_v3 = vld [vmem:[#allocation2 + $0xa8] sm:$0xf0]  ;;  %v644_v5 = vor.u32 %v845_v61, %v641_v63  ;;  %v648_v6 = vor.u32 %v850_v1, %v647_v0  ;;  %v607_v7 = vld [vmem:[#allocation2 + $0x40] sm:$0xf]  ;;  %v837_v9 = vld [vmem:[#allocation2 + $0x44] sm:$0xf] }
  0x1c   :  { %476 = vmatpush.bf16.msra.mxu2 %v712_v46  ;;  %v841_v8 = vld [vmem:[#allocation2 + $0x5c] sm:$0xf0]  ;;  %v652_v10 = vor.u32 %v846_v2, %v649_v3  ;;  %v609_v11 = vld [vmem:[#allocation2 + $0x60] sm:$0xf0]  ;;  %v615_v12 = vld [vmem:[#allocation2 + $0x48] sm:$0xf] }
  0x1d   :  { %489 = vmatpush.bf16.msra.mxu3 %v716_v50  ;;  %v842_v13 = vld [vmem:[#allocation2 + $0x64] sm:$0xf0]  ;;  %v838_v14 = vld [vmem:[#allocation2 + $0x4c] sm:$0xf]  ;;  %v608_v16 = vor.u32 %v841_v8, %v607_v7  ;;  %v575_v17 = vld [vmem:[#allocation2] sm:$0xf]  ;;  %v612_v19 = vor.u32 %v837_v9, %v609_v11 }
  0x1e   :  { %v617_v15 = vld [vmem:[#allocation2 + $0x68] sm:$0xf0]  ;;  %v833_v18 = vld [vmem:[#allocation2 + $0x1c] sm:$0xf0]  ;;  %v616_v20 = vor.u32 %v842_v13, %v615_v12  ;;  %v829_v21 = vld [vmem:[#allocation2 + $0x4] sm:$0xf] }
  0x1f   :  { %451 = vmatpush.bf16.msra.mxu0 %v672_v56  ;;  %464 = vmatpush.bf16.msra.mxu1 %v676_v57  ;;  %v577_v22 = vld [vmem:[#allocation2 + $0x20] sm:$0xf0]  ;;  %v583_v23 = vld [vmem:[#allocation2 + $0x8] sm:$0xf]  ;;  %v620_v24 = vor.u32 %v838_v14, %v617_v15  ;;  %v830_v26 = vld [vmem:[#allocation2 + $0xc] sm:$0xf]  ;;  %v576_v31 = vor.u32 %v833_v18, %v575_v17 }
  0x20   :  { %477 = vmatpush.bf16.msra.mxu2 %v680_v58  ;;  %v834_v25 = vld [vmem:[#allocation2 + $0x24] sm:$0xf0]  ;;  %v585_v27 = vld [vmem:[#allocation2 + $0x28] sm:$0xf0]  ;;  %v815_v28 = vld [vmem:[#allocation2 + $0x1d0] sm:$0xf]  ;;  %v580_v35 = vor.u32 %v829_v21, %v577_v22 }
  0x21   :  { %490 = vmatpush.bf16.msra.mxu3 %v684_v62  ;;  %v891_v29 = vld [vmem:[#allocation2 + $0x1ec] sm:$0xf0]  ;;  %v887_v30 = vld [vmem:[#allocation2 + $0x1d4] sm:$0xf]  ;;  %v823_v33 = vld [vmem:[#allocation2 + $0x1d8] sm:$0xf]  ;;  %v584_v36 = vor.u32 %v834_v25, %v583_v23  ;;  %v588_v39 = vor.u32 %v830_v26, %v585_v27 }
  0x22   :  { %v817_v32 = vld [vmem:[#allocation2 + $0x1f0] sm:$0xf0]  ;;  %v892_v34 = vld [vmem:[#allocation2 + $0x1f4] sm:$0xf0]  ;;  %v888_v37 = vld [vmem:[#allocation2 + $0x1dc] sm:$0xf]  ;;  %v816_v40 = vor.u32 %v891_v29, %v815_v28 }
  0x23   :  { %452 = vmatpush.bf16.msra.mxu0 %v640_v4  ;;  %465 = vmatpush.bf16.msra.mxu1 %v644_v5  ;;  %v825_v38 = vld [vmem:[#allocation2 + $0x1f8] sm:$0xf0]  ;;  %v820_v41 = vor.u32 %v887_v30, %v817_v32  ;;  %v824_v42 = vor.u32 %v892_v34, %v823_v33  ;;  %v783_v43 = vld [vmem:[#allocation2 + $0x190] sm:$0xf]  ;;  %v879_v45 = vld [vmem:[#allocation2 + $0x194] sm:$0xf] }
  0x24   :  { %478 = vmatpush.bf16.msra.mxu2 %v648_v6  ;;  %v883_v44 = vld [vmem:[#allocation2 + $0x1ac] sm:$0xf0]  ;;  %v828_v46 = vor.u32 %v888_v37, %v825_v38  ;;  %v785_v47 = vld [vmem:[#allocation2 + $0x1b0] sm:$0xf0]  ;;  %v791_v48 = vld [vmem:[#allocation2 + $0x198] sm:$0xf] }
  0x25   :  { %491 = vmatpush.bf16.msra.mxu3 %v652_v10  ;;  %v884_v49 = vld [vmem:[#allocation2 + $0x1b4] sm:$0xf0]  ;;  %v880_v50 = vld [vmem:[#allocation2 + $0x19c] sm:$0xf]  ;;  %v982_v52 = vld [vmem:[%s1004_s0] sm:$0xf]  ;;  %v784_v53 = vor.u32 %v883_v44, %v783_v43  ;;  %v788_v54 = vor.u32 %v879_v45, %v785_v47 }
  0x26   :  { %v793_v51 = vld [vmem:[#allocation2 + $0x1b8] sm:$0xf0]  ;;  %v792_v55 = vor.u32 %v884_v49, %v791_v48  ;;  %v751_v56 = vld [vmem:[#allocation2 + $0x150] sm:$0xf]  ;;  %v871_v58 = vld [vmem:[#allocation2 + $0x154] sm:$0xf] }
  0x27   :  { %453 = vmatpush.bf16.msra.mxu0 %v608_v16  ;;  %466 = vmatpush.bf16.msra.mxu1 %v612_v19  ;;  %v875_v57 = vld [vmem:[#allocation2 + $0x16c] sm:$0xf0]  ;;  %v796_v59 = vor.u32 %v880_v50, %v793_v51  ;;  %v753_v60 = vld [vmem:[#allocation2 + $0x170] sm:$0xf0]  ;;  %v759_v61 = vld [vmem:[#allocation2 + $0x158] sm:$0xf] }
  0x28   :  { %479 = vmatpush.bf16.msra.mxu2 %v616_v20  ;;  %v876_v62 = vld [vmem:[#allocation2 + $0x174] sm:$0xf0]  ;;  %v872_v63 = vld [vmem:[#allocation2 + $0x15c] sm:$0xf]  ;;  %v752_v1 = vor.u32 %v875_v57, %v751_v56  ;;  %v756_v2 = vor.u32 %v871_v58, %v753_v60  ;;  %v719_v4 = vld [vmem:[#allocation2 + $0x110] sm:$0xf] }
  0x29   :  { %492 = vmatpush.bf16.msra.mxu3 %v620_v24  ;;  %v761_v0 = vld [vmem:[#allocation2 + $0x178] sm:$0xf0]  ;;  %v760_v3 = vor.u32 %v876_v62, %v759_v61  ;;  %v867_v5 = vld [vmem:[#allocation2 + $0x12c] sm:$0xf0]  ;;  %v863_v6 = vld [vmem:[#allocation2 + $0x114] sm:$0xf] }
  0x2a   :  { %v764_v7 = vor.u32 %v872_v63, %v761_v0  ;;  %v721_v8 = vld [vmem:[#allocation2 + $0x130] sm:$0xf0]  ;;  %v727_v9 = vld [vmem:[#allocation2 + $0x118] sm:$0xf]  ;;  %v864_v11 = vld [vmem:[#allocation2 + $0x11c] sm:$0xf]  ;;  %v720_v13 = vor.u32 %v867_v5, %v719_v4 }
  0x2b   :  { %454 = vmatpush.bf16.msra.mxu0 %v576_v31  ;;  %467 = vmatpush.bf16.msra.mxu1 %v580_v35  ;;  %v868_v10 = vld [vmem:[#allocation2 + $0x134] sm:$0xf0]  ;;  %v729_v12 = vld [vmem:[#allocation2 + $0x138] sm:$0xf0]  ;;  %v724_v14 = vor.u32 %v863_v6, %v721_v8  ;;  %v687_v16 = vld [vmem:[#allocation2 + $0xd0] sm:$0xf] }
  0x2c   :  { %480 = vmatpush.bf16.msra.mxu2 %v584_v36  ;;  %v728_v15 = vor.u32 %v868_v10, %v727_v9  ;;  %v859_v17 = vld [vmem:[#allocation2 + $0xec] sm:$0xf0]  ;;  %v855_v18 = vld [vmem:[#allocation2 + $0xd4] sm:$0xf]  ;;  %v732_v19 = vor.u32 %v864_v11, %v729_v12  ;;  %v695_v21 = vld [vmem:[#allocation2 + $0xd8] sm:$0xf] }
  0x2d   :  { %493 = vmatpush.bf16.msra.mxu3 %v588_v39  ;;  %v689_v20 = vld [vmem:[#allocation2 + $0xf0] sm:$0xf0]  ;;  %v860_v22 = vld [vmem:[#allocation2 + $0xf4] sm:$0xf0]  ;;  %v856_v23 = vld [vmem:[#allocation2 + $0xdc] sm:$0xf]  ;;  %v688_v25 = vor.u32 %v859_v17, %v687_v16 }
  0x2e   :  { %455 = vmatmul.bf16.vlgmr.msra.gmra.mxu0 %v982_v52  ;;  %468 = vmatmul.bf16.vlgmr.msra.gmra.mxu1 %v982_v52  ;;  %v697_v24 = vld [vmem:[#allocation2 + $0xf8] sm:$0xf0]  ;;  %v692_v26 = vor.u32 %v855_v18, %v689_v20  ;;  %v696_v27 = vor.u32 %v860_v22, %v695_v21  ;;  %v655_v28 = vld [vmem:[#allocation2 + $0x90] sm:$0xf]  ;;  %v847_v30 = vld [vmem:[#allocation2 + $0x94] sm:$0xf] }
  0x2f   :  { %499 = vmatpush.bf16.msrb.mxu0 %v816_v40  ;;  %512 = vmatpush.bf16.msrb.mxu1 %v820_v41  ;;  %v851_v29 = vld [vmem:[#allocation2 + $0xac] sm:$0xf0]  ;;  %v700_v31 = vor.u32 %v856_v23, %v697_v24  ;;  %v657_v32 = vld [vmem:[#allocation2 + $0xb0] sm:$0xf0]  ;;  %v663_v33 = vld [vmem:[#allocation2 + $0x98] sm:$0xf] }
  0x30   :  { %525 = vmatpush.bf16.msrb.mxu2 %v824_v42  ;;  %494 = vmatmul.bf16.vlgmr.msra.gmra.mxu3 %v982_v52  ;;  %v852_v34 = vld [vmem:[#allocation2 + $0xb4] sm:$0xf0]  ;;  %v848_v35 = vld [vmem:[#allocation2 + $0x9c] sm:$0xf]  ;;  %v656_v37 = vor.u32 %v851_v29, %v655_v28  ;;  %v660_v38 = vor.u32 %v847_v30, %v657_v32  ;;  %v623_v40 = vld [vmem:[#allocation2 + $0x50] sm:$0xf] }
  0x31   :  { %538 = vmatpush.bf16.msrb.mxu3 %v828_v46  ;;  %481 = vmatmul.bf16.vlgmr.msra.gmra.mxu2 %v982_v52  ;;  %v665_v36 = vld [vmem:[#allocation2 + $0xb8] sm:$0xf0]  ;;  %v664_v39 = vor.u32 %v852_v34, %v663_v33  ;;  %v843_v41 = vld [vmem:[#allocation2 + $0x6c] sm:$0xf0]  ;;  %v839_v42 = vld [vmem:[#allocation2 + $0x54] sm:$0xf] }
  0x32   :  { %v668_v43 = vor.u32 %v848_v35, %v665_v36  ;;  %v625_v44 = vld [vmem:[#allocation2 + $0x70] sm:$0xf0]  ;;  %v631_v45 = vld [vmem:[#allocation2 + $0x58] sm:$0xf]  ;;  %v840_v47 = vld [vmem:[#allocation2 + $0x5c] sm:$0xf]  ;;  %v624_v49 = vor.u32 %v843_v41, %v623_v40 }
  0x33   :  { %500 = vmatpush.bf16.msrb.mxu0 %v784_v53  ;;  %513 = vmatpush.bf16.msrb.mxu1 %v788_v54  ;;  %v844_v46 = vld [vmem:[#allocation2 + $0x74] sm:$0xf0]  ;;  %v633_v48 = vld [vmem:[#allocation2 + $0x78] sm:$0xf0]  ;;  %v628_v50 = vor.u32 %v839_v42, %v625_v44  ;;  %v591_v53 = vld [vmem:[#allocation2 + $0x10] sm:$0xf] }
  0x34   :  { %526 = vmatpush.bf16.msrb.mxu2 %v792_v55  ;;  %v632_v51 = vor.u32 %v844_v46, %v631_v45  ;;  %v835_v54 = vld [vmem:[#allocation2 + $0x2c] sm:$0xf0]  ;;  %v831_v55 = vld [vmem:[#allocation2 + $0x14] sm:$0xf]  ;;  %v636_v56 = vor.u32 %v840_v47, %v633_v48  ;;  %v599_v58 = vld [vmem:[#allocation2 + $0x18] sm:$0xf] }
  0x35   :  { %539 = vmatpush.bf16.msrb.mxu3 %v796_v59  ;;  %v593_v57 = vld [vmem:[#allocation2 + $0x30] sm:$0xf0]  ;;  %v836_v59 = vld [vmem:[#allocation2 + $0x34] sm:$0xf0]  ;;  %v832_v60 = vld [vmem:[#allocation2 + $0x1c] sm:$0xf]  ;;  %v592_v62 = vor.u32 %v835_v54, %v591_v53 }
  0x36   :  { %v601_v61 = vld [vmem:[#allocation2 + $0x38] sm:$0xf0]  ;;  %v596_v63 = vor.u32 %v831_v55, %v593_v57  ;;  %v600_v0 = vor.u32 %v836_v59, %v599_v58 }
  0x37   :  { %501 = vmatpush.bf16.msrb.mxu0 %v752_v1  ;;  %514 = vmatpush.bf16.msrb.mxu1 %v756_v2  ;;  %v604_v1 = vor.u32 %v832_v60, %v601_v61  ;;  %v109_v2 = vld [vmem:[#allocation4] sm:$0xff] }
  0x38   :  { %527 = vmatpush.bf16.msrb.mxu2 %v760_v3  ;;  %v111_v3 = vperm.slane %v109_v2, 0  ;;  %v112_v4 = vperm.slane %v109_v2, 1  ;;  %v113_v9 = vperm.slane %v109_v2, 2  ;;  %v114_v11 = vperm.slane %v109_v2, 3 }
  0x39   :  { %540 = vmatpush.bf16.msrb.mxu3 %v764_v7  ;;  %v115_v24 = vperm.slane %v109_v2, 4  ;;  %v117_v32 = vperm.slane %v109_v2, 6  ;;  %v118_v33 = vperm.slane %v109_v2, 7 }
  0x3b   :  { %502 = vmatpush.bf16.msrb.mxu0 %v720_v13  ;;  %515 = vmatpush.bf16.msrb.mxu1 %v724_v14 }
  0x3c   :  { %528 = vmatpush.bf16.msrb.mxu2 %v728_v15 }
  0x3d   :  { %541 = vmatpush.bf16.msrb.mxu3 %v732_v19 }
  0x3f   :  { %503 = vmatpush.bf16.msrb.mxu0 %v688_v25  ;;  %516 = vmatpush.bf16.msrb.mxu1 %v692_v26  ;;  %v116_v25 = vperm.slane %v109_v2, 5 }
  0x40   :  { %529 = vmatpush.bf16.msrb.mxu2 %v696_v27 }
  0x41   :  { %542 = vmatpush.bf16.msrb.mxu3 %v700_v31 }
  0x43   :  { %504 = vmatpush.bf16.msrb.mxu0 %v656_v37  ;;  %517 = vmatpush.bf16.msrb.mxu1 %v660_v38 }
  0x44   :  { %530 = vmatpush.bf16.msrb.mxu2 %v664_v39 }
  0x45   :  { %543 = vmatpush.bf16.msrb.mxu3 %v668_v43 }
  0x47   :  { %505 = vmatpush.bf16.msrb.mxu0 %v624_v49  ;;  %518 = vmatpush.bf16.msrb.mxu1 %v628_v50 }
  0x48   :  { %531 = vmatpush.bf16.msrb.mxu2 %v632_v51 }
  0x49   :  { %544 = vmatpush.bf16.msrb.mxu3 %v636_v56 }
  0x4b   :  { %506 = vmatpush.bf16.msrb.mxu0 %v592_v62  ;;  %519 = vmatpush.bf16.msrb.mxu1 %v596_v63 }
  0x4c   :  { %532 = vmatpush.bf16.msrb.mxu2 %v600_v0 }
  0x4d   :  { %545 = vmatpush.bf16.msrb.mxu3 %v604_v1 }
  0x4e   :  { %507 = vmatmul.bf16.vlgmr.msrb.gmra.mxu0 %v982_v52  ;;  %520 = vmatmul.bf16.vlgmr.msrb.gmra.mxu1 %v982_v52 }
  0x4f   :  { %533 = vmatmul.bf16.vlgmr.msrb.gmra.mxu2 %v982_v52 }
  0x50   :  { %546 = vmatmul.bf16.vlgmr.msrb.gmra.mxu3 %v982_v52 }
  0xab   :  { %v456_v5 = vpop.f32.mrf.mxu0  ;;  %v469_v7 = vpop.f32.mrf.mxu1 }
  0xac   :  { %v457_v6 = vadd.f32 %v456_v5, %v111_v3  ;;  %v470_v8 = vadd.f32 %v469_v7, %v112_v4 }
  0xae   :  { %v551_v10 = vmax.f32 %v457_v6, 0.0  ;;  %v552_v12 = vmax.f32 %v470_v8, 0.0 }
  0xb0   :  { %v559_v14 = vpack.c.bf16 %v552_v12, %v551_v10 }
  0xb2   :  { %563 = vst [vmem:[%s1007_s3] sm:$0xff] %v559_v14 }
  0xb3   :  { %v495_v16 = vpop.f32.mrf.mxu3  ;;  %v458_v18 = vpop.f32.mrf.mxu0 }
  0xb4   :  { %v482_v13 = vpop.f32.mrf.mxu2  ;;  %v496_v17 = vadd.f32 %v495_v16, %v114_v11  ;;  %v471_v20 = vpop.f32.mrf.mxu1 }
  0xb5   :  { %v483_v15 = vadd.f32 %v482_v13, %v113_v9 }
  0xb6   :  { %v554_v19 = vmax.f32 %v496_v17, 0.0 }
  0xb7   :  { %v553_v52 = vmax.f32 %v483_v15, 0.0 }
  0xb9   :  { %v560_v21 = vpack.c.bf16 %v554_v19, %v553_v52 }
  0xbb   :  { %564 = vst [vmem:[%s1007_s3 + $0x8] sm:$0xff] %v560_v21  ;;  %v497_v23 = vpop.f32.mrf.mxu3 }
  0xbc   :  { %v484_v22 = vpop.f32.mrf.mxu2 }
  0xcb   :  { %v508_v26 = vpop.f32.mrf.mxu0  ;;  %v521_v28 = vpop.f32.mrf.mxu1 }
  0xcc   :  { %v509_v27 = vadd.f32 %v508_v26, %v115_v24  ;;  %v522_v29 = vadd.f32 %v521_v28, %v116_v25 }
  0xce   :  { %v555_v30 = vmax.f32 %v509_v27, 0.0  ;;  %v556_v31 = vmax.f32 %v522_v29, 0.0 }
  0xd0   :  { %v561_v34 = vpack.c.bf16 %v556_v31, %v555_v30 }
  0xd2   :  { %v534_v35 = vpop.f32.mrf.mxu2  ;;  %565 = vst [vmem:[%s1007_s3 + $0x10] sm:$0xff] %v561_v34 }
  0xd3   :  { %v535_v36 = vadd.f32 %v534_v35, %v117_v32  ;;  %v547_v37 = vpop.f32.mrf.mxu3  ;;  %v510_v38 = vpop.f32.mrf.mxu0 }
  0xd4   :  { %v548_v39 = vadd.f32 %v547_v37, %v118_v33  ;;  %v523_v40 = vpop.f32.mrf.mxu1 }
  0xd5   :  { %v557_v41 = vmax.f32 %v535_v36, 0.0 }
  0xd6   :  { %v558_v42 = vmax.f32 %v548_v39, 0.0 }
  0xd8   :  { %v562_v43 = vpack.c.bf16 %v558_v42, %v557_v41 }
  0xda   :  { %566 = vst [vmem:[%s1007_s3 + $0x18] sm:$0xff] %v562_v43  ;;  %v536_v44 = vpop.f32.mrf.mxu2 }
  0xdb   :  { %v549_v45 = vpop.f32.mrf.mxu3 }
  0xdc   :  { %571 = vsyncpa [#allocation3], 1 }
  0xdd   :  { %572 = vsyncpa [#allocation5], 1 }

// kernel: _lambda_.6
= control target key start
LH: loop header
LB: loop body
LE: loop exit
PB: predicated region body
PF: predicated region fallthrough
CT: control target
= control target key end

     0   :  { %8 = vsyncpa [#allocation3], 0  ;;  %s919_s0 = inlined_call_operand.vmem [shape: bf16[32,576], index: 0, kind: input, shape index: {}]   ;;  %s920_s1 = inlined_call_operand.hbm [shape: bf16[576,128], index: 1, kind: input, shape index: {}]   ;;  %s921_s2 = inlined_call_operand.hbm [shape: f32[1,128], index: 2, kind: input, shape index: {}]   ;;  %s922_s3 = inlined_call_operand.vmem [shape: bf16[32,128], index: 3, kind: output, shape index: {}]  }
   0x1   :  { %s16_s14 = sshll.u32 %s920_s1, 4  ;;  %s17_s14 = int_to_ptr.hbm [resolvable:$true] %s16_s14 }
   0x2   :  { %9 = vsyncpa [#allocation5], 0  ;;  %s823_s15 = smov [#allocation2]   ;;  %s30_s19 = sshll.u32 %s921_s2, 4  ;;  %s31_s19 = int_to_ptr.hbm [resolvable:$true] %s30_s19 }
   0x3   :  { %s18_s16 = sshll.u32 %s823_s15, 4  ;;  %s824_s20 = smov 64   ;;  %s19_s16 = int_to_ptr.vmem [resolvable:$true] %s18_s16 }
   0x4   :  { %s825_s21 = smov 4   ;;  %s826_s22 = smov [#allocation4]  }
   0x5   :  { %24 = dma.hbm_to_vmem [thread:$0]  %s17_s14, 4608, %s19_s16, [#allocation3], %s824_s20, %s824_s20, %s825_s21  }
   0x6   :  { %s32_s23 = sshll.u32 %s826_s22, 4  ;;  %s33_s23 = int_to_ptr.vmem [resolvable:$true] %s32_s23 }
   0x7   :  { %35 = dma.hbm_to_vmem [thread:$0]  %s31_s19, 16, %s33_s23, [#allocation5]  }
   0x8   :  { %819 = dma.done.wait [#allocation3], 4608  }
   0x9   :  { %820 = vsyncadd [#allocation3], 4294962688 }
   0xa   :  { %821 = dma.done.wait [#allocation5], 16  }
   0xb   :  { %822 = vsyncadd [#allocation5], 4294967280  ;;  %v722_v0 = vld [vmem:[#allocation2 + $0x38] sm:$0xff]  ;;  %v721_v4 = vld [vmem:[#allocation2 + $0x30] sm:$0xff]  ;;  %vm399_vm0 = vcmask 523264  }
   0xc   :  { %v730_v1 = vld [vmem:[#allocation2 + $0x78] sm:$0xff]  ;;  %406 = vmatpush.bf16.msra.mxu0 %v722_v0  ;;  %v729_v5 = vld [vmem:[#allocation2 + $0x70] sm:$0xff]  ;;  %v720_v8 = vld [vmem:[#allocation2 + $0x28] sm:$0xff] }
   0xd   :  { %v738_v2 = vld [vmem:[#allocation2 + $0xb8] sm:$0xff]  ;;  %425 = vmatpush.bf16.msra.mxu1 %v730_v1  ;;  %v737_v6 = vld [vmem:[#allocation2 + $0xb0] sm:$0xff]  ;;  %v728_v9 = vld [vmem:[#allocation2 + $0x68] sm:$0xff] }
   0xe   :  { %v746_v3 = vld [vmem:[#allocation2 + $0xf8] sm:$0xff]  ;;  %444 = vmatpush.bf16.msra.mxu2 %v738_v2  ;;  %v745_v7 = vld [vmem:[#allocation2 + $0xf0] sm:$0xff]  ;;  %v736_v10 = vld [vmem:[#allocation2 + $0xa8] sm:$0xff] }
   0xf   :  { %463 = vmatpush.bf16.msra.mxu3 %v746_v3  ;;  %v744_v11 = vld [vmem:[#allocation2 + $0xe8] sm:$0xff]  ;;  %v719_v12 = vld [vmem:[#allocation2 + $0x20] sm:$0xff]  ;;  %v718_v16 = vld [vmem:[#allocation2 + $0x18] sm:$0xff] }
  0x10   :  { %407 = vmatpush.bf16.msra.mxu0 %v721_v4  ;;  %v727_v13 = vld [vmem:[#allocation2 + $0x60] sm:$0xff]  ;;  %v726_v17 = vld [vmem:[#allocation2 + $0x58] sm:$0xff]  ;;  %v717_v20 = vld [vmem:[#allocation2 + $0x10] sm:$0xff] }
  0x11   :  { %426 = vmatpush.bf16.msra.mxu1 %v729_v5  ;;  %v735_v14 = vld [vmem:[#allocation2 + $0xa0] sm:$0xff]  ;;  %v734_v18 = vld [vmem:[#allocation2 + $0x98] sm:$0xff]  ;;  %v725_v21 = vld [vmem:[#allocation2 + $0x50] sm:$0xff] }
  0x12   :  { %445 = vmatpush.bf16.msra.mxu2 %v737_v6  ;;  %v743_v15 = vld [vmem:[#allocation2 + $0xe0] sm:$0xff]  ;;  %v742_v19 = vld [vmem:[#allocation2 + $0xd8] sm:$0xff]  ;;  %v733_v22 = vld [vmem:[#allocation2 + $0x90] sm:$0xff] }
  0x13   :  { %464 = vmatpush.bf16.msra.mxu3 %v745_v7  ;;  %v741_v23 = vld [vmem:[#allocation2 + $0xd0] sm:$0xff]  ;;  %v716_v24 = vld [vmem:[#allocation2 + $0x8] sm:$0xff]  ;;  %v715_v28 = vld [vmem:[#allocation2] sm:$0xff] }
  0x14   :  { %408 = vmatpush.bf16.msra.mxu0 %v720_v8  ;;  %v724_v25 = vld [vmem:[#allocation2 + $0x48] sm:$0xff]  ;;  %v723_v29 = vld [vmem:[#allocation2 + $0x40] sm:$0xff]  ;;  %v707_v33 = vld [vmem:[%s919_s0 + $0x10] sm:$0xf0] }
  0x15   :  { %427 = vmatpush.bf16.msra.mxu1 %v728_v9  ;;  %v732_v26 = vld [vmem:[#allocation2 + $0x88] sm:$0xff]  ;;  %v731_v30 = vld [vmem:[#allocation2 + $0x80] sm:$0xff]  ;;  %v523_v35 = vld [vmem:[%s919_s0 + $0x14] sm:$0xf0] }
  0x16   :  { %446 = vmatpush.bf16.msra.mxu2 %v736_v10  ;;  %v740_v27 = vld [vmem:[#allocation2 + $0xc8] sm:$0xff]  ;;  %v739_v31 = vld [vmem:[#allocation2 + $0xc0] sm:$0xff]  ;;  %v708_v37 = vld [vmem:[%s919_s0 + $0x18] sm:$0xf0] }
  0x17   :  { %465 = vmatpush.bf16.msra.mxu3 %v744_v11  ;;  %v521_v32 = vld [vmem:[%s919_s0] sm:$0xf]  ;;  %v705_v34 = vld [vmem:[%s919_s0 + $0x4] sm:$0xf]  ;;  %v529_v36 = vld [vmem:[%s919_s0 + $0x8] sm:$0xf] }
  0x18   :  { %409 = vmatpush.bf16.msra.mxu0 %v719_v12  ;;  %v706_v38 = vld [vmem:[%s919_s0 + $0xc] sm:$0xf]  ;;  %v531_v39 = vld [vmem:[%s919_s0 + $0x1c] sm:$0xf0]  ;;  %v750_v40 = vld [vmem:[#allocation2 + $0x118] sm:$0xff]  ;;  %v522_v41 = vor.u32 %v707_v33, %v521_v32  ;;  %v526_v42 = vor.u32 %v705_v34, %v523_v35  ;;  %v530_v43 = vor.u32 %v708_v37, %v529_v36 }
  0x19   :  { %428 = vmatpush.bf16.msra.mxu1 %v727_v13  ;;  %v534_v44 = vor.u32 %v706_v38, %v531_v39  ;;  %v749_v45 = vld [vmem:[#allocation2 + $0x110] sm:$0xff]  ;;  %v748_v46 = vld [vmem:[#allocation2 + $0x108] sm:$0xff]  ;;  %v747_v47 = vld [vmem:[#allocation2 + $0x100] sm:$0xff] }
  0x1a   :  { %447 = vmatpush.bf16.msra.mxu2 %v735_v14  ;;  %v541_v48 = vld [vmem:[%s919_s0 + $0x28] sm:$0xf]  ;;  %v712_v49 = vld [vmem:[%s919_s0 + $0x38] sm:$0xf0]  ;;  %v710_v50 = vld [vmem:[%s919_s0 + $0x2c] sm:$0xf] }
  0x1b   :  { %466 = vmatpush.bf16.msra.mxu3 %v743_v15  ;;  %v543_v51 = vld [vmem:[%s919_s0 + $0x3c] sm:$0xf0]  ;;  %v549_v52 = vld [vmem:[%s919_s0 + $0x30] sm:$0xf]  ;;  %v713_v53 = vld [vmem:[%s919_s0 + $0x40] sm:$0xf0]  ;;  %v542_v56 = vor.u32 %v712_v49, %v541_v48 }
  0x1c   :  { %410 = vmatpush.bf16.msra.mxu0 %v718_v16  ;;  %v711_v54 = vld [vmem:[%s919_s0 + $0x34] sm:$0xf]  ;;  %v551_v55 = vld [vmem:[%s919_s0 + $0x44] sm:$0xf0]  ;;  %v546_v57 = vor.u32 %v710_v50, %v543_v51  ;;  %v550_v58 = vor.u32 %v713_v53, %v549_v52  ;;  %v537_v60 = vld [vmem:[%s919_s0 + $0x10] sm:$0xf] }
  0x1d   :  { %429 = vmatpush.bf16.msra.mxu1 %v726_v17  ;;  %v554_v59 = vor.u32 %v711_v54, %v551_v55  ;;  %v709_v61 = vld [vmem:[%s919_s0 + $0x20] sm:$0xf0]  ;;  %v557_v62 = vld [vmem:[%s919_s0 + $0x38] sm:$0xf]  ;;  %v714_v63 = vld [vmem:[%s919_s0 + $0x48] sm:$0xf0] }
  0x1e   :  { %448 = vmatpush.bf16.msra.mxu2 %v734_v18  ;;  %v538_v0 = vor.u32 %v709_v61, %v537_v60  ;;  %v558_v1 = vor.u32 %v714_v63, %v557_v62  ;;  %v770_v12 = vld [vmem:[#allocation4] ss:$0 sm:$0xff] }
  0x1f   :  { %467 = vmatpush.bf16.msra.mxu3 %v742_v19 }
  0x20   :  { %411 = vmatpush.bf16.msra.mxu0 %v717_v20 }
  0x21   :  { %430 = vmatpush.bf16.msra.mxu1 %v725_v21 }
  0x22   :  { %449 = vmatpush.bf16.msra.mxu2 %v733_v22 }
  0x23   :  { %468 = vmatpush.bf16.msra.mxu3 %v741_v23 }
  0x24   :  { %412 = vmatpush.bf16.msra.mxu0 %v716_v24 }
  0x25   :  { %431 = vmatpush.bf16.msra.mxu1 %v724_v25 }
  0x26   :  { %450 = vmatpush.bf16.msra.mxu2 %v732_v26 }
  0x27   :  { %469 = vmatpush.bf16.msra.mxu3 %v740_v27 }
  0x28   :  { %413 = vmatpush.bf16.msra.mxu0 %v715_v28 }
  0x29   :  { %432 = vmatpush.bf16.msra.mxu1 %v723_v29 }
  0x2a   :  { %451 = vmatpush.bf16.msra.mxu2 %v731_v30 }
  0x2b   :  { %470 = vmatpush.bf16.msra.mxu3 %v739_v31  ;;  %414 = vmatmul.bf16.vlgmr.msra.gmra.mxu0 %v522_v41 }
  0x2c   :  { %486 = vmatpush.bf16.msrb.mxu0 %v750_v40  ;;  %433 = vmatmul.bf16.vlgmr.msra.gmra.mxu1 %v526_v42 }
  0x2d   :  { %762 = vmatpush.bf16.msrb.mxu1 %v750_v40  ;;  %452 = vmatmul.bf16.vlgmr.msra.gmra.mxu2 %v530_v43 }
  0x2e   :  { %471 = vmatmul.bf16.vlgmr.msra.gmra.mxu3 %v534_v44 }
  0x30   :  { %487 = vmatpush.bf16.msrb.mxu0 %v749_v45 }
  0x31   :  { %763 = vmatpush.bf16.msrb.mxu1 %v749_v45 }
  0x34   :  { %488 = vmatpush.bf16.msrb.mxu0 %v748_v46 }
  0x35   :  { %764 = vmatpush.bf16.msrb.mxu1 %v748_v46 }
  0x38   :  { %489 = vmatpush.bf16.msrb.mxu0 %v747_v47 }
  0x39   :  { %765 = vmatpush.bf16.msrb.mxu1 %v747_v47 }
  0x3b   :  { %419 = vmatmul.bf16.gmra.mxu0 %v542_v56 }
  0x3c   :  { %438 = vmatmul.bf16.gmra.mxu1 %v546_v57 }
  0x3d   :  { %457 = vmatmul.bf16.gmra.mxu2 %v550_v58 }
  0x3e   :  { %476 = vmatmul.bf16.gmra.mxu3 %v554_v59 }
  0x4b   :  { %703 = vmatmul.msk.bf16.vlgmr.msrb.gmra.mxu0 %vm399_vm0, %v538_v0 }
  0x4c   :  { %704 = vmatmul.msk.bf16.vlgmr.msrb.gmra.mxu1 %vm399_vm0, %v558_v1 }
  0xa8   :  { %v415_v2 = vpop.f32.mrf.mxu0 }
  0xa9   :  { %v434_v3 = vpop.f32.mrf.mxu1  ;;  %v416_v16 = vadd.f32 %v770_v12, %v415_v2 }
  0xab   :  { %v435_v21 = vadd.f32 %v434_v3, %v416_v16 }
  0xb0   :  { %v453_v4 = vpop.f32.mrf.mxu2  ;;  %v417_v6 = vpop.f32.mrf.mxu0 }
  0xb1   :  { %v472_v5 = vpop.f32.mrf.mxu3  ;;  %v436_v7 = vpop.f32.mrf.mxu1  ;;  %v418_v19 = vadd.f32 %v770_v12, %v417_v6  ;;  %v454_v26 = vadd.f32 %v453_v4, %v435_v21 }
  0xb3   :  { %v437_v27 = vadd.f32 %v436_v7, %v418_v19  ;;  %v473_v32 = vadd.f32 %v472_v5, %v454_v26 }
  0xb8   :  { %v455_v8 = vpop.f32.mrf.mxu2  ;;  %v420_v9 = vpop.f32.mrf.mxu0 }
  0xb9   :  { %v439_v10 = vpop.f32.mrf.mxu1  ;;  %v474_v11 = vpop.f32.mrf.mxu3  ;;  %v421_v17 = vadd.f32 %v770_v12, %v420_v9  ;;  %v456_v30 = vadd.f32 %v455_v8, %v437_v27 }
  0xbb   :  { %v440_v22 = vadd.f32 %v439_v10, %v421_v17  ;;  %v475_v35 = vadd.f32 %v474_v11, %v456_v30 }
  0xc0   :  { %v458_v13 = vpop.f32.mrf.mxu2  ;;  %v422_v14 = vpop.f32.mrf.mxu0 }
  0xc1   :  { %v441_v15 = vpop.f32.mrf.mxu1  ;;  %v477_v18 = vpop.f32.mrf.mxu3  ;;  %v423_v20 = vadd.f32 %v770_v12, %v422_v14  ;;  %v459_v28 = vadd.f32 %v458_v13, %v440_v22 }
  0xc3   :  { %v442_v29 = vadd.f32 %v441_v15, %v423_v20  ;;  %v478_v33 = vadd.f32 %v477_v18, %v459_v28 }
  0xc8   :  { %v460_v23 = vpop.f32.mrf.mxu2  ;;  %v491_v24 = vpop.f32.mrf.mxu0 }
  0xc9   :  { %v496_v25 = vpop.f32.mrf.mxu1  ;;  %v461_v31 = vadd.f32 %v460_v23, %v442_v29  ;;  %v479_v34 = vpop.f32.mrf.mxu3  ;;  %v492_v37 = vadd.f32 %v491_v24, %v473_v32 }
  0xca   :  { %v497_v38 = vadd.f32 %v496_v25, %v478_v33 }
  0xcb   :  { %v480_v36 = vadd.f32 %v479_v34, %v461_v31  ;;  %v501_v43 = vmax.f32 %v492_v37, 0.0 }
  0xcc   :  { %v503_v44 = vmax.f32 %v497_v38, 0.0 }
  0xd0   :  { %v493_v39 = vpop.f32.mrf.mxu0 }
  0xd1   :  { %v498_v40 = vpop.f32.mrf.mxu1  ;;  %v494_v41 = vadd.f32 %v493_v39, %v475_v35 }
  0xd2   :  { %v499_v42 = vadd.f32 %v498_v40, %v480_v36 }
  0xd3   :  { %v502_v45 = vmax.f32 %v494_v41, 0.0 }
  0xd4   :  { %v504_v46 = vmax.f32 %v499_v42, 0.0 }
  0xd5   :  { %v754_v47 = vpack.c.bf16 %v502_v45, %v501_v43 }
  0xd6   :  { %v759_v48 = vpack.c.bf16 %v504_v46, %v503_v44 }
  0xd7   :  { %755 = vst [vmem:[%s922_s3] sm:$0xff] %v754_v47  }
  0xd8   :  { %761 = vst [vmem:[%s922_s3 + $0x8] sm:$0xff] %v759_v48  }
  0xd9   :  { %517 = vsyncpa [#allocation3], 1 }
  0xda   :  { %518 = vsyncpa [#allocation5], 1 }

// kernel: _lambda_.7
= control target key start
LH: loop header
LB: loop body
LE: loop exit
PB: predicated region body
PF: predicated region fallthrough
CT: control target
= control target key end

     0   :  { %8 = vsyncpa [#allocation3], 0  ;;  %s1133_s0 = inlined_call_operand.vmem [shape: bf16[128,288], index: 0, kind: input, shape index: {}]   ;;  %s1134_s1 = inlined_call_operand.hbm [shape: bf16[288,128], index: 1, kind: input, shape index: {}]   ;;  %s1135_s2 = inlined_call_operand.hbm [shape: f32[1,128], index: 2, kind: input, shape index: {}]   ;;  %s1136_s3 = inlined_call_operand.vmem [shape: bf16[128,128], index: 3, kind: output, shape index: {}]  }
   0x1   :  { %s16_s14 = sshll.u32 %s1134_s1, 4  ;;  %s17_s14 = int_to_ptr.hbm [resolvable:$true] %s16_s14 }
   0x2   :  { %9 = vsyncpa [#allocation5], 0  ;;  %s909_s15 = smov [#allocation2]   ;;  %s30_s19 = sshll.u32 %s1135_s2, 4  ;;  %s31_s19 = int_to_ptr.hbm [resolvable:$true] %s30_s19 }
   0x3   :  { %s18_s16 = sshll.u32 %s909_s15, 4  ;;  %s910_s20 = smov 64   ;;  %s19_s16 = int_to_ptr.vmem [resolvable:$true] %s18_s16 }
   0x4   :  { %s911_s21 = smov 4   ;;  %s912_s22 = smov [#allocation4]  }
   0x5   :  { %24 = dma.hbm_to_vmem [thread:$0]  %s17_s14, 2304, %s19_s16, [#allocation3], %s910_s20, %s910_s20, %s911_s21  }
   0x6   :  { %s32_s23 = sshll.u32 %s912_s22, 4  ;;  %s33_s23 = int_to_ptr.vmem [resolvable:$true] %s32_s23 }
   0x7   :  { %35 = dma.hbm_to_vmem [thread:$0]  %s31_s19, 16, %s33_s23, [#allocation5]  }
   0x8   :  { %905 = dma.done.wait [#allocation3], 2304  }
   0x9   :  { %906 = vsyncadd [#allocation3], 4294964992 }
   0xa   :  { %907 = dma.done.wait [#allocation5], 16  }
   0xb   :  { %908 = vsyncadd [#allocation5], 4294967280  ;;  %v778_v0 = vld [vmem:[#allocation2 + $0x38] sm:$0xff]  ;;  %v788_v1 = vld [vmem:[#allocation2 + $0x88] sm:$0xff]  ;;  %vm345_vm0 = vcmask 261120  }
   0xc   :  { %v786_v2 = vld [vmem:[#allocation2 + $0x78] sm:$0xff]  ;;  %370 = vmatpush.bf16.msra.mxu0 %v778_v0  ;;  %836 = vmatpush.bf16.msra.mxu3 %v778_v0  ;;  %v777_v3 = vld [vmem:[#allocation2 + $0x30] sm:$0xff]  ;;  %v787_v4 = vld [vmem:[#allocation2 + $0x80] sm:$0xff] }
   0xd   :  { %474 = vmatpush.bf16.msra.mxu2 %v788_v1  ;;  %419 = vmatpush.bf16.msra.mxu1 %v786_v2  ;;  %v785_v5 = vld [vmem:[#allocation2 + $0x70] sm:$0xff]  ;;  %v581_v6 = vld [vmem:[%s1133_s0 + $0x8] sm:$0xf]  ;;  %v775_v11 = vld [vmem:[#allocation2 + $0x20] sm:$0xff] }
   0xe   :  { %v749_v7 = vld [vmem:[%s1133_s0 + $0x10] sm:$0xf0]  ;;  %v776_v9 = vld [vmem:[#allocation2 + $0x28] sm:$0xff]  ;;  %v783_v12 = vld [vmem:[#allocation2 + $0x60] sm:$0xff] }
   0xf   :  { %v582_v8 = vor.u32 %v749_v7, %v581_v6  ;;  %v784_v10 = vld [vmem:[#allocation2 + $0x68] sm:$0xff]  ;;  %v774_v13 = vld [vmem:[#allocation2 + $0x18] sm:$0xff]  ;;  %v773_v15 = vld [vmem:[#allocation2 + $0x10] sm:$0xff] }
  0x10   :  { %371 = vmatpush.bf16.msra.mxu0 %v777_v3  ;;  %837 = vmatpush.bf16.msra.mxu3 %v777_v3  ;;  %v782_v14 = vld [vmem:[#allocation2 + $0x58] sm:$0xff]  ;;  %v781_v16 = vld [vmem:[#allocation2 + $0x50] sm:$0xff]  ;;  %v593_v17 = vld [vmem:[%s1133_s0 + $0x20] sm:$0xf] }
  0x11   :  { %475 = vmatpush.bf16.msra.mxu2 %v787_v4  ;;  %420 = vmatpush.bf16.msra.mxu1 %v785_v5  ;;  %v752_v18 = vld [vmem:[%s1133_s0 + $0x28] sm:$0xf0]  ;;  %v771_v22 = vld [vmem:[#allocation2] sm:$0xff]  ;;  %v645_v26 = vld [vmem:[%s1133_s0 + $0x90] sm:$0xf] }
  0x12   :  { %v594_v19 = vor.u32 %v752_v18, %v593_v17  ;;  %v772_v20 = vld [vmem:[#allocation2 + $0x8] sm:$0xff]  ;;  %v779_v23 = vld [vmem:[#allocation2 + $0x40] sm:$0xff]  ;;  %v766_v27 = vld [vmem:[%s1133_s0 + $0x98] sm:$0xf0] }
  0x13   :  { %v780_v21 = vld [vmem:[#allocation2 + $0x48] sm:$0xff]  ;;  %v573_v24 = vld [vmem:[%s1133_s0] sm:$0xf]  ;;  %v747_v28 = vld [vmem:[%s1133_s0 + $0x4] sm:$0xf]  ;;  %v646_v31 = vor.u32 %v766_v27, %v645_v26 }
  0x14   :  { %739 = vmatmul.msk.bf16.vlgmr.msra.gmra.mxu2 %vm345_vm0, %v582_v8  ;;  %372 = vmatpush.bf16.msra.mxu0 %v776_v9  ;;  %v748_v25 = vld [vmem:[%s1133_s0 + $0x8] sm:$0xf0]  ;;  %v575_v29 = vld [vmem:[%s1133_s0 + $0xc] sm:$0xf0]  ;;  %v605_v33 = vld [vmem:[%s1133_s0 + $0x38] sm:$0xf] }
  0x15   :  { %838 = vmatpush.bf16.msra.mxu3 %v776_v9  ;;  %421 = vmatpush.bf16.msra.mxu1 %v784_v10  ;;  %v574_v30 = vor.u32 %v748_v25, %v573_v24  ;;  %v578_v32 = vor.u32 %v747_v28, %v575_v29  ;;  %v755_v34 = vld [vmem:[%s1133_s0 + $0x40] sm:$0xf0]  ;;  %v585_v36 = vld [vmem:[%s1133_s0 + $0x18] sm:$0xf]  ;;  %v657_v38 = vld [vmem:[%s1133_s0 + $0xa8] sm:$0xf] }
  0x16   :  { %v606_v35 = vor.u32 %v755_v34, %v605_v33  ;;  %v751_v37 = vld [vmem:[%s1133_s0 + $0x20] sm:$0xf0]  ;;  %v769_v39 = vld [vmem:[%s1133_s0 + $0xb0] sm:$0xf0]  ;;  %v750_v40 = vld [vmem:[%s1133_s0 + $0x1c] sm:$0xf] }
  0x17   :  { %v587_v41 = vld [vmem:[%s1133_s0 + $0x24] sm:$0xf0]  ;;  %v586_v42 = vor.u32 %v751_v37, %v585_v36  ;;  %v658_v43 = vor.u32 %v769_v39, %v657_v38  ;;  %v617_v45 = vld [vmem:[%s1133_s0 + $0x50] sm:$0xf]  ;;  %v758_v46 = vld [vmem:[%s1133_s0 + $0x58] sm:$0xf0] }
  0x18   :  { %373 = vmatpush.bf16.msra.mxu0 %v775_v11  ;;  %v590_v44 = vor.u32 %v750_v40, %v587_v41  ;;  %v618_v47 = vor.u32 %v758_v46, %v617_v45  ;;  %v597_v48 = vld [vmem:[%s1133_s0 + $0x30] sm:$0xf]  ;;  %v754_v49 = vld [vmem:[%s1133_s0 + $0x38] sm:$0xf0]  ;;  %v765_v50 = vld [vmem:[%s1133_s0 + $0x94] sm:$0xf] }
  0x19   :  { %839 = vmatpush.bf16.msra.mxu3 %v775_v11  ;;  %422 = vmatpush.bf16.msra.mxu1 %v783_v12  ;;  %v647_v51 = vld [vmem:[%s1133_s0 + $0x9c] sm:$0xf0]  ;;  %v753_v52 = vld [vmem:[%s1133_s0 + $0x34] sm:$0xf]  ;;  %v598_v54 = vor.u32 %v754_v49, %v597_v48  ;;  %v629_v57 = vld [vmem:[%s1133_s0 + $0x68] sm:$0xf] }
  0x1a   :  { %v599_v53 = vld [vmem:[%s1133_s0 + $0x3c] sm:$0xf0]  ;;  %v650_v55 = vor.u32 %v765_v50, %v647_v51  ;;  %v761_v58 = vld [vmem:[%s1133_s0 + $0x70] sm:$0xf0]  ;;  %v609_v60 = vld [vmem:[%s1133_s0 + $0x48] sm:$0xf] }
  0x1b   :  { %v602_v56 = vor.u32 %v753_v52, %v599_v53  ;;  %v630_v59 = vor.u32 %v761_v58, %v629_v57  ;;  %v757_v61 = vld [vmem:[%s1133_s0 + $0x50] sm:$0xf0]  ;;  %v768_v62 = vld [vmem:[%s1133_s0 + $0xac] sm:$0xf]  ;;  %v659_v63 = vld [vmem:[%s1133_s0 + $0xb4] sm:$0xf0] }
  0x1c   :  { %374 = vmatpush.bf16.msra.mxu0 %v774_v13  ;;  %v756_v0 = vld [vmem:[%s1133_s0 + $0x4c] sm:$0xf]  ;;  %v611_v1 = vld [vmem:[%s1133_s0 + $0x54] sm:$0xf0]  ;;  %v662_v3 = vor.u32 %v768_v62, %v659_v63  ;;  %v621_v8 = vld [vmem:[%s1133_s0 + $0x60] sm:$0xf] }
  0x1d   :  { %840 = vmatpush.bf16.msra.mxu3 %v774_v13  ;;  %423 = vmatpush.bf16.msra.mxu1 %v782_v14  ;;  %v614_v4 = vor.u32 %v756_v0, %v611_v1  ;;  %v764_v6 = vld [vmem:[%s1133_s0 + $0x88] sm:$0xf0]  ;;  %v623_v11 = vld [vmem:[%s1133_s0 + $0x6c] sm:$0xf0]  ;;  %v633_v17 = vld [vmem:[%s1133_s0 + $0x78] sm:$0xf] }
  0x1e   :  { %v760_v9 = vld [vmem:[%s1133_s0 + $0x68] sm:$0xf0]  ;;  %v763_v18 = vld [vmem:[%s1133_s0 + $0x80] sm:$0xf0]  ;;  %v770_v24 = vld [vmem:[%s1133_s0 + $0xb8] sm:$0xf0] }
  0x1f   :  { %v1091_v29 = vld [vmem:[#allocation4] ss:$0 sm:$0xff] }
  0x20   :  { %375 = vmatpush.bf16.msra.mxu0 %v773_v15 }
  0x21   :  { %841 = vmatpush.bf16.msra.mxu3 %v773_v15  ;;  %424 = vmatpush.bf16.msra.mxu1 %v781_v16  ;;  %v767_v15 = vld [vmem:[%s1133_s0 + $0xa0] sm:$0xf0] }
  0x24   :  { %740 = vmatmul.msk.bf16.gmra.mxu2 %vm345_vm0, %v594_v19  ;;  %376 = vmatpush.bf16.msra.mxu0 %v772_v20  ;;  %v762_v19 = vld [vmem:[%s1133_s0 + $0x7c] sm:$0xf] }
  0x25   :  { %842 = vmatpush.bf16.msra.mxu3 %v772_v20  ;;  %425 = vmatpush.bf16.msra.mxu1 %v780_v21  ;;  %v635_v20 = vld [vmem:[%s1133_s0 + $0x84] sm:$0xf0] }
  0x28   :  { %377 = vmatpush.bf16.msra.mxu0 %v771_v22 }
  0x29   :  { %843 = vmatpush.bf16.msra.mxu3 %v771_v22  ;;  %426 = vmatpush.bf16.msra.mxu1 %v779_v23  ;;  %v638_v22 = vor.u32 %v762_v19, %v635_v20 }
  0x2b   :  { %378 = vmatmul.bf16.vlgmr.msra.gmra.mxu0 %v574_v30 }
  0x2c   :  { %408 = vmatmul.bf16.vlgmr.msra.gmra.mxu3 %v646_v31  ;;  %427 = vmatmul.bf16.vlgmr.msra.gmra.mxu1 %v578_v32 }
  0x2d   :  { %844 = vmatpush.bf16.msrb.mxu3 %v786_v2  ;;  %v610_v2 = vor.u32 %v757_v61, %v609_v60 }
  0x31   :  { %845 = vmatpush.bf16.msrb.mxu3 %v785_v5  ;;  %v641_v5 = vld [vmem:[%s1133_s0 + $0x80] sm:$0xf] }
  0x32   :  { %v642_v7 = vor.u32 %v764_v6, %v641_v5 }
  0x34   :  { %741 = vmatmul.msk.bf16.gmra.mxu2 %vm345_vm0, %v606_v35 }
  0x35   :  { %846 = vmatpush.bf16.msrb.mxu3 %v784_v10  ;;  %v759_v10 = vld [vmem:[%s1133_s0 + $0x64] sm:$0xf] }
  0x36   :  { %v626_v13 = vor.u32 %v759_v10, %v623_v11 }
  0x39   :  { %847 = vmatpush.bf16.msrb.mxu3 %v783_v12  ;;  %v622_v12 = vor.u32 %v760_v9, %v621_v8 }
  0x3b   :  { %383 = vmatmul.bf16.gmra.mxu0 %v586_v42 }
  0x3c   :  { %413 = vmatmul.bf16.gmra.mxu3 %v658_v43  ;;  %432 = vmatmul.bf16.gmra.mxu1 %v590_v44 }
  0x3d   :  { %848 = vmatpush.bf16.msrb.mxu3 %v782_v14  ;;  %v653_v14 = vld [vmem:[%s1133_s0 + $0x98] sm:$0xf] }
  0x41   :  { %849 = vmatpush.bf16.msrb.mxu3 %v781_v16  ;;  %v654_v16 = vor.u32 %v767_v15, %v653_v14 }
  0x44   :  { %742 = vmatmul.msk.bf16.gmra.mxu2 %vm345_vm0, %v618_v47 }
  0x45   :  { %850 = vmatpush.bf16.msrb.mxu3 %v780_v21  ;;  %v634_v21 = vor.u32 %v763_v18, %v633_v17 }
  0x49   :  { %851 = vmatpush.bf16.msrb.mxu3 %v779_v23  ;;  %v665_v23 = vld [vmem:[%s1133_s0 + $0xb0] sm:$0xf] }
  0x4a   :  { %v666_v25 = vor.u32 %v770_v24, %v665_v23 }
  0x4b   :  { %388 = vmatmul.bf16.gmra.mxu0 %v598_v54 }
  0x4c   :  { %457 = vmatmul.bf16.vlgmr.msrb.gmra.mxu3 %v650_v55  ;;  %437 = vmatmul.bf16.gmra.mxu1 %v602_v56 }
  0x54   :  { %743 = vmatmul.msk.bf16.gmra.mxu2 %vm345_vm0, %v630_v59 }
  0x5b   :  { %393 = vmatmul.bf16.gmra.mxu0 %v610_v2 }
  0x5c   :  { %462 = vmatmul.bf16.gmra.mxu3 %v662_v3  ;;  %442 = vmatmul.bf16.gmra.mxu1 %v614_v4 }
  0x64   :  { %744 = vmatmul.msk.bf16.gmra.mxu2 %vm345_vm0, %v642_v7 }
  0x6b   :  { %398 = vmatmul.bf16.gmra.mxu0 %v622_v12 }
  0x6c   :  { %447 = vmatmul.bf16.gmra.mxu1 %v626_v13 }
  0x74   :  { %745 = vmatmul.msk.bf16.gmra.mxu2 %vm345_vm0, %v654_v16 }
  0x7b   :  { %403 = vmatmul.bf16.gmra.mxu0 %v634_v21 }
  0x7c   :  { %452 = vmatmul.bf16.gmra.mxu1 %v638_v22 }
  0x84   :  { %746 = vmatmul.msk.bf16.gmra.mxu2 %vm345_vm0, %v666_v25 }
  0x97   :  { %v477_v26 = vpop.f32.mrf.mxu2 }
  0x9f   :  { %v479_v27 = vpop.f32.mrf.mxu2 }
  0xa7   :  { %v482_v28 = vpop.f32.mrf.mxu2 }
  0xa8   :  { %v379_v30 = vpop.f32.mrf.mxu0 }
  0xa9   :  { %v428_v31 = vpop.f32.mrf.mxu1  ;;  %v380_v32 = vadd.f32 %v1091_v29, %v379_v30 }
  0xab   :  { %v429_v33 = vadd.f32 %v428_v31, %v380_v32 }
  0xad   :  { %v478_v38 = vadd.f32 %v477_v26, %v429_v33 }
  0xaf   :  { %v484_v34 = vpop.f32.mrf.mxu2  ;;  %v517_v41 = vmax.f32 %v478_v38, 0.0  ;;  %v409_v55 = vpop.f32.mrf.mxu3 }
  0xb0   :  { %v381_v35 = vpop.f32.mrf.mxu0 }
  0xb1   :  { %v382_v36 = vadd.f32 %v1091_v29, %v381_v35  ;;  %v430_v37 = vpop.f32.mrf.mxu1 }
  0xb3   :  { %v431_v39 = vadd.f32 %v430_v37, %v382_v36 }
  0xb5   :  { %v480_v40 = vadd.f32 %v479_v27, %v431_v39 }
  0xb7   :  { %v518_v42 = vmax.f32 %v480_v40, 0.0  ;;  %v487_v43 = vpop.f32.mrf.mxu2  ;;  %v411_v0 = vpop.f32.mrf.mxu3 }
  0xb8   :  { %v384_v44 = vpop.f32.mrf.mxu0 }
  0xb9   :  { %v792_v45 = vpack.c.bf16 %v518_v42, %v517_v41  ;;  %v433_v46 = vpop.f32.mrf.mxu1  ;;  %v385_v47 = vadd.f32 %v1091_v29, %v384_v44 }
  0xbb   :  { %793 = vst [vmem:[%s1136_s3] sm:$0xff] %v792_v45   ;;  %v434_v48 = vadd.f32 %v433_v46, %v385_v47  ;;  %v410_v47 = vadd.f32 %v1091_v29, %v409_v55 }
  0xbd   :  { %v483_v53 = vadd.f32 %v482_v28, %v434_v48 }
  0xbf   :  { %v489_v49 = vpop.f32.mrf.mxu2  ;;  %v519_v57 = vmax.f32 %v483_v53, 0.0  ;;  %v414_v13 = vpop.f32.mrf.mxu3 }
  0xc0   :  { %v386_v50 = vpop.f32.mrf.mxu0 }
  0xc1   :  { %v387_v51 = vadd.f32 %v1091_v29, %v386_v50  ;;  %v435_v52 = vpop.f32.mrf.mxu1 }
  0xc3   :  { %v436_v54 = vadd.f32 %v435_v52, %v387_v51  ;;  %v412_v51 = vadd.f32 %v1091_v29, %v411_v0 }
  0xc5   :  { %v485_v56 = vadd.f32 %v484_v34, %v436_v54 }
  0xc7   :  { %v520_v58 = vmax.f32 %v485_v56, 0.0  ;;  %v492_v59 = vpop.f32.mrf.mxu2  ;;  %v416_v22 = vpop.f32.mrf.mxu3 }
  0xc8   :  { %v389_v60 = vpop.f32.mrf.mxu0 }
  0xc9   :  { %v797_v61 = vpack.c.bf16 %v520_v58, %v519_v57  ;;  %v438_v62 = vpop.f32.mrf.mxu1  ;;  %v390_v63 = vadd.f32 %v1091_v29, %v389_v60 }
  0xcb   :  { %829 = vst [vmem:[%s1136_s3 + $0x8] sm:$0xff] %v797_v61   ;;  %v439_v1 = vadd.f32 %v438_v62, %v390_v63 }
  0xcd   :  { %v488_v6 = vadd.f32 %v487_v43, %v439_v1 }
  0xcf   :  { %v494_v2 = vpop.f32.mrf.mxu2  ;;  %v521_v9 = vmax.f32 %v488_v6, 0.0  ;;  %v458_v34 = vpop.f32.mrf.mxu3 }
  0xd0   :  { %v391_v3 = vpop.f32.mrf.mxu0  ;;  %v459_v53 = vadd.f32 %v458_v34, %v410_v47 }
  0xd1   :  { %v392_v4 = vadd.f32 %v1091_v29, %v391_v3  ;;  %v440_v5 = vpop.f32.mrf.mxu1 }
  0xd3   :  { %v441_v7 = vadd.f32 %v440_v5, %v392_v4 }
  0xd5   :  { %v490_v8 = vadd.f32 %v489_v49, %v441_v7 }
  0xd7   :  { %v522_v10 = vmax.f32 %v490_v8, 0.0  ;;  %v497_v11 = vpop.f32.mrf.mxu2  ;;  %v460_v43 = vpop.f32.mrf.mxu3  ;;  %v415_v8 = vadd.f32 %v1091_v29, %v414_v13 }
  0xd8   :  { %v394_v12 = vpop.f32.mrf.mxu0  ;;  %v461_v54 = vadd.f32 %v460_v43, %v412_v51 }
  0xd9   :  { %v802_v14 = vpack.c.bf16 %v522_v10, %v521_v9  ;;  %v443_v15 = vpop.f32.mrf.mxu1  ;;  %v395_v16 = vadd.f32 %v1091_v29, %v394_v12  ;;  %v417_v10 = vadd.f32 %v1091_v29, %v416_v22 }
  0xdb   :  { %830 = vst [vmem:[%s1136_s3 + $0x10] sm:$0xff] %v802_v14   ;;  %v444_v17 = vadd.f32 %v443_v15, %v395_v16 }
  0xdd   :  { %v493_v23 = vadd.f32 %v492_v59, %v444_v17 }
  0xdf   :  { %v499_v18 = vpop.f32.mrf.mxu2  ;;  %v523_v26 = vmax.f32 %v493_v23, 0.0  ;;  %v463_v61 = vpop.f32.mrf.mxu3 }
  0xe0   :  { %v396_v19 = vpop.f32.mrf.mxu0  ;;  %v464_v12 = vadd.f32 %v463_v61, %v415_v8 }
  0xe1   :  { %v397_v20 = vadd.f32 %v1091_v29, %v396_v19  ;;  %v445_v21 = vpop.f32.mrf.mxu1 }
  0xe3   :  { %v446_v24 = vadd.f32 %v445_v21, %v397_v20 }
  0xe5   :  { %v495_v25 = vadd.f32 %v494_v2, %v446_v24 }
  0xe7   :  { %v524_v27 = vmax.f32 %v495_v25, 0.0  ;;  %v502_v28 = vpop.f32.mrf.mxu2 }
  0xe8   :  { %v399_v30 = vpop.f32.mrf.mxu0 }
  0xe9   :  { %v807_v31 = vpack.c.bf16 %v524_v27, %v523_v26  ;;  %v448_v32 = vpop.f32.mrf.mxu1  ;;  %v400_v33 = vadd.f32 %v1091_v29, %v399_v30 }
  0xeb   :  { %831 = vst [vmem:[%s1136_s3 + $0x18] sm:$0xff] %v807_v31   ;;  %v449_v35 = vadd.f32 %v448_v32, %v400_v33 }
  0xed   :  { %v498_v40 = vadd.f32 %v497_v11, %v449_v35  ;;  %v465_v11 = vpop.f32.mrf.mxu3 }
  0xee   :  { %v466_v14 = vadd.f32 %v465_v11, %v417_v10 }
  0xef   :  { %v504_v36 = vpop.f32.mrf.mxu2  ;;  %v525_v44 = vmax.f32 %v498_v40, 0.0 }
  0xf0   :  { %v401_v37 = vpop.f32.mrf.mxu0 }
  0xf1   :  { %v402_v38 = vadd.f32 %v1091_v29, %v401_v37  ;;  %v450_v39 = vpop.f32.mrf.mxu1 }
  0xf3   :  { %v451_v41 = vadd.f32 %v450_v39, %v402_v38 }
  0xf5   :  { %v500_v42 = vadd.f32 %v499_v18, %v451_v41 }
  0xf7   :  { %v526_v45 = vmax.f32 %v500_v42, 0.0  ;;  %v507_v46 = vpop.f32.mrf.mxu2 }
  0xf8   :  { %v404_v48 = vpop.f32.mrf.mxu0  ;;  %v508_v56 = vadd.f32 %v507_v46, %v459_v53 }
  0xf9   :  { %v812_v49 = vpack.c.bf16 %v526_v45, %v525_v44  ;;  %v453_v50 = vpop.f32.mrf.mxu1  ;;  %v405_v52 = vadd.f32 %v1091_v29, %v404_v48 }
  0xfa   :  { %v529_v63 = vmax.f32 %v508_v56, 0.0 }
  0xfb   :  { %832 = vst [vmem:[%s1136_s3 + $0x20] sm:$0xff] %v812_v49   ;;  %v454_v57 = vadd.f32 %v453_v50, %v405_v52 }
  0xfd   :  { %v503_v0 = vadd.f32 %v502_v28, %v454_v57 }
  0xff   :  { %v509_v58 = vpop.f32.mrf.mxu2  ;;  %v527_v5 = vmax.f32 %v503_v0, 0.0 }
 0x100   :  { %v510_v59 = vadd.f32 %v509_v58, %v461_v54  ;;  %v406_v60 = vpop.f32.mrf.mxu0 }
 0x101   :  { %v407_v55 = vadd.f32 %v1091_v29, %v406_v60  ;;  %v455_v62 = vpop.f32.mrf.mxu1 }
 0x102   :  { %v530_v1 = vmax.f32 %v510_v59, 0.0 }
 0x103   :  { %v456_v2 = vadd.f32 %v455_v62, %v407_v55 }
 0x104   :  { %v822_v3 = vpack.c.bf16 %v530_v1, %v529_v63 }
 0x105   :  { %v505_v4 = vadd.f32 %v504_v36, %v456_v2 }
 0x106   :  { %834 = vst [vmem:[%s1136_s3 + $0x30] sm:$0xff] %v822_v3  }
 0x107   :  { %v528_v6 = vmax.f32 %v505_v4, 0.0  ;;  %v512_v7 = vpop.f32.mrf.mxu2 }
 0x108   :  { %v513_v15 = vadd.f32 %v512_v7, %v464_v12 }
 0x109   :  { %v817_v9 = vpack.c.bf16 %v528_v6, %v527_v5 }
 0x10a   :  { %v531_v18 = vmax.f32 %v513_v15, 0.0 }
 0x10b   :  { %833 = vst [vmem:[%s1136_s3 + $0x28] sm:$0xff] %v817_v9  }
 0x10f   :  { %v514_v16 = vpop.f32.mrf.mxu2 }
 0x110   :  { %v515_v17 = vadd.f32 %v514_v16, %v466_v14 }
 0x112   :  { %v532_v19 = vmax.f32 %v515_v17, 0.0 }
 0x114   :  { %v827_v20 = vpack.c.bf16 %v532_v19, %v531_v18 }
 0x116   :  { %835 = vst [vmem:[%s1136_s3 + $0x38] sm:$0xff] %v827_v20  }
 0x117   :  { %569 = vsyncpa [#allocation3], 1 }
 0x118   :  { %570 = vsyncpa [#allocation5], 1 }

// kernel: _lambda_.8
= control target key start
LH: loop header
LB: loop body
LE: loop exit
PB: predicated region body
PF: predicated region fallthrough
CT: control target
= control target key end

     0   :  { %8 = vsyncpa [#allocation3], 0  ;;  %s1526_s0 = inlined_call_operand.vmem [shape: bf16[512,144], index: 0, kind: input, shape index: {}]   ;;  %s1527_s1 = inlined_call_operand.hbm [shape: bf16[144,128], index: 1, kind: input, shape index: {}]   ;;  %s1528_s2 = inlined_call_operand.hbm [shape: f32[1,128], index: 2, kind: input, shape index: {}]   ;;  %s1529_s3 = inlined_call_operand.vmem [shape: bf16[512,128], index: 3, kind: output, shape index: {}]  }
   0x1   :  { %9 = vsyncpa [#allocation5], 0  ;;  %s1337_s12 = smov 0  }
   0x2 LB: > { %s125_s15 = sshll.u32 %s1527_s1, 4  ;;  %s863_s16 = sadd.s32 4294967295, %s1311_s12   ;;  %s1311_s12 = sphi %s1337_s12, %s15_s12   ;;  %s126_s15 = int_to_ptr.hbm [resolvable:$true] %s125_s15 }
   0x3   : > { %p865_p0 = scmp.ge.s32.totalorder %s1311_s12, 1  ;;  %p114_p1 = scmp.lt.s32.totalorder %s1311_s12, 3 }
   0x4   : > { %p1348_p2 = scmp.eq.s32.totalorder %s863_s16, 0  ;;  %s1313_s19 = smov [#allocation2]  }
   0x5   : > { %p1352_p3 = pnand %p865_p0, %p114_p1  ;;  %s127_s20 = sshll.u32 %s1313_s19, 4  ;;  %s128_s20 = int_to_ptr.vmem [resolvable:$true] %s127_s20 }
   0x6   : > { %s140_s23 = sshll.u32 %s1528_s2, 4  ;;  %s1314_s24 = smov [#allocation4]   ;;  %s141_s23 = int_to_ptr.hbm [resolvable:$true] %s140_s23 }
   0x7   : > { %p1213_p4 = pneg %p1352_p3  ;;  %s142_s25 = sshll.u32 %s1314_s24, 4  ;;  %s143_s25 = int_to_ptr.vmem [resolvable:$true] %s142_s25 }
   0x8   : > { %s1315_s26 = smov 64   ;;  %s1316_s27 = smov 4  }
   0x9   : > { %p1214_p5 = pnand %p1348_p2, %p1213_p4  ;;  %165 = sbr.rel (%p1352_p3) target bundleno = 311 (0x137), region = 32 }
   0xb   : > { %1216 = dma.hbm_to_vmem [thread:$0]  (!%p1214_p5), %s126_s15, 1152, %s128_s20, [#allocation3], %s1315_s26, %s1315_s26, %s1316_s27  }
   0xc   : > { %1219 = dma.hbm_to_vmem [thread:$0]  (!%p1214_p5), %s141_s23, 16, %s143_s25, [#allocation5]  }
   0xe   : > { %1302 = dma.done.wait (%p1348_p2), [#allocation3], 1152  }
   0xf   : > { %1304 = vsyncadd (%p1348_p2), [#allocation3], 4294966144 }
  0x10   : > { %1306 = dma.done.wait (%p1348_p2), [#allocation5], 16  }
  0x11   : > { %1308 = vsyncadd (%p1348_p2), [#allocation5], 4294967280  ;;  %s872_s28 = sshll.u32 %s863_s16, 5  ;;  %v1099_v0 = vld [vmem:[#allocation2 + $0x38] sm:$0xff]  ;;  %v1100_v1 = vld [vmem:[#allocation2 + $0x40] sm:$0xff]  ;;  %vm462_vm0 = vcmask 130048  }
  0x12   : > { %p197_p6 = scmp.lt.s32.totalorder %s872_s28, 63  ;;  %511 = vmatpush.bf16.msra.mxu0 %v1099_v0  ;;  %1196 = vmatpush.bf16.msra.mxu2 %v1099_v0  ;;  %v1098_v5 = vld [vmem:[#allocation2 + $0x30] sm:$0xff]  ;;  %v1097_v6 = vld [vmem:[#allocation2 + $0x28] sm:$0xff]  ;;  %v1096_v10 = vld [vmem:[#allocation2 + $0x20] sm:$0xff] }
  0x13   : > { %607 = vmatpush.bf16.msra.mxu1 %v1100_v1  ;;  %1204 = vmatpush.bf16.msra.mxu3 %v1100_v1  ;;  %v1095_v11 = vld [vmem:[#allocation2 + $0x18] sm:$0xff]  ;;  %v1094_v15 = vld [vmem:[#allocation2 + $0x10] sm:$0xff]  ;;  %v1093_v16 = vld [vmem:[#allocation2 + $0x8] sm:$0xff] }
  0x14   : > { %s1533_s28 = smov (!%p197_p6, %s872_s28), 63  ;;  %v1092_v20 = vld [vmem:[#allocation2] sm:$0xff] }
  0x15   : > { %s1059_s29 = sshll.u32 %s1533_s28, 3  ;;  %s876_s6 = sshll.u32 %s1533_s28, 2 }
  0x16   : > { %s1379_s5 = scalar_lea.vmem %s1526_s0, %s1059_s29  ;;  %512 = vmatpush.bf16.msra.mxu0 %v1098_v5  ;;  %1197 = vmatpush.bf16.msra.mxu2 %v1098_v5  ;;  %s1471_s9 = scalar_lea.vmem %s1529_s3, %s876_s6 }
  0x17   : > { %v1060_v2 = vld [vmem:[%s1379_s5 + $0x4] sm:$0xf]  ;;  %v881_v3 = vld [vmem:[%s1379_s5 + $0x8] sm:$0xf0]  ;;  %v1078_v7 = vld [vmem:[%s1379_s5 + $0x94] sm:$0xf] }
  0x18   : > { %v884_v4 = vor.u32 %v1060_v2, %v881_v3  ;;  %v953_v8 = vld [vmem:[%s1379_s5 + $0x98] sm:$0xf0]  ;;  %v1062_v12 = vld [vmem:[%s1379_s5 + $0x14] sm:$0xf]  ;;  %v1080_v17 = vld [vmem:[%s1379_s5 + $0xa4] sm:$0xf] }
  0x19   : > { %v956_v9 = vor.u32 %v1078_v7, %v953_v8  ;;  %v889_v13 = vld [vmem:[%s1379_s5 + $0x18] sm:$0xf0]  ;;  %v961_v18 = vld [vmem:[%s1379_s5 + $0xa8] sm:$0xf0]  ;;  %v879_v21 = vld [vmem:[%s1379_s5] sm:$0xf] }
  0x1a   : > { %1041 = vmatmul.msk.bf16.vlgmr.msra.gmra.mxu1 %vm462_vm0, %v884_v4  ;;  %513 = vmatpush.bf16.msra.mxu0 %v1097_v6  ;;  %v892_v14 = vor.u32 %v1062_v12, %v889_v13  ;;  %v964_v19 = vor.u32 %v1080_v17, %v961_v18  ;;  %v1061_v22 = vld [vmem:[%s1379_s5 + $0x4] sm:$0xf0]  ;;  %v943_v23 = vld [vmem:[%s1379_s5 + $0x80] sm:$0xf]  ;;  %v1064_v27 = vld [vmem:[%s1379_s5 + $0x24] sm:$0xf] }
  0x1b   : > { %1050 = vmatmul.msk.bf16.vlgmr.msra.gmra.mxu3 %vm462_vm0, %v956_v9  ;;  %1198 = vmatpush.bf16.msra.mxu2 %v1097_v6  ;;  %v1077_v24 = vld [vmem:[%s1379_s5 + $0x84] sm:$0xf0]  ;;  %v880_v25 = vor.u32 %v1061_v22, %v879_v21  ;;  %v897_v28 = vld [vmem:[%s1379_s5 + $0x28] sm:$0xf0]  ;;  %v1082_v30 = vld [vmem:[%s1379_s5 + $0xb4] sm:$0xf] }
  0x1c   : > { %v944_v26 = vor.u32 %v1077_v24, %v943_v23  ;;  %v900_v29 = vor.u32 %v1064_v27, %v897_v28  ;;  %v969_v31 = vld [vmem:[%s1379_s5 + $0xb8] sm:$0xf0]  ;;  %v887_v33 = vld [vmem:[%s1379_s5 + $0x10] sm:$0xf]  ;;  %v1063_v34 = vld [vmem:[%s1379_s5 + $0x14] sm:$0xf0] }
  0x1d   : > { %v972_v32 = vor.u32 %v1082_v30, %v969_v31  ;;  %v951_v35 = vld [vmem:[%s1379_s5 + $0x90] sm:$0xf]  ;;  %v1079_v36 = vld [vmem:[%s1379_s5 + $0x94] sm:$0xf0]  ;;  %v888_v37 = vor.u32 %v1063_v34, %v887_v33  ;;  %v1066_v39 = vld [vmem:[%s1379_s5 + $0x34] sm:$0xf] }
  0x1e   : > { %514 = vmatpush.bf16.msra.mxu0 %v1096_v10  ;;  %v952_v38 = vor.u32 %v1079_v36, %v951_v35  ;;  %v905_v40 = vld [vmem:[%s1379_s5 + $0x38] sm:$0xf0]  ;;  %v1084_v42 = vld [vmem:[%s1379_s5 + $0xc4] sm:$0xf]  ;;  %v977_v43 = vld [vmem:[%s1379_s5 + $0xc8] sm:$0xf0] }
  0x1f   : > { %1199 = vmatpush.bf16.msra.mxu2 %v1096_v10  ;;  %v908_v41 = vor.u32 %v1066_v39, %v905_v40  ;;  %v980_v44 = vor.u32 %v1084_v42, %v977_v43  ;;  %v895_v45 = vld [vmem:[%s1379_s5 + $0x20] sm:$0xf]  ;;  %v1065_v46 = vld [vmem:[%s1379_s5 + $0x24] sm:$0xf0]  ;;  %v1068_v51 = vld [vmem:[%s1379_s5 + $0x44] sm:$0xf] }
  0x20   : > { %v959_v47 = vld [vmem:[%s1379_s5 + $0xa0] sm:$0xf]  ;;  %v1081_v48 = vld [vmem:[%s1379_s5 + $0xa4] sm:$0xf0]  ;;  %v896_v49 = vor.u32 %v1065_v46, %v895_v45  ;;  %v913_v52 = vld [vmem:[%s1379_s5 + $0x48] sm:$0xf0] }
  0x21   : > { %v960_v50 = vor.u32 %v1081_v48, %v959_v47  ;;  %v916_v53 = vor.u32 %v1068_v51, %v913_v52  ;;  %v1086_v54 = vld [vmem:[%s1379_s5 + $0xd4] sm:$0xf]  ;;  %v985_v55 = vld [vmem:[%s1379_s5 + $0xd8] sm:$0xf0]  ;;  %v903_v57 = vld [vmem:[%s1379_s5 + $0x30] sm:$0xf] }
  0x22   : > { %515 = vmatpush.bf16.msra.mxu0 %v1095_v11  ;;  %v988_v56 = vor.u32 %v1086_v54, %v985_v55  ;;  %v1067_v58 = vld [vmem:[%s1379_s5 + $0x34] sm:$0xf0]  ;;  %v967_v59 = vld [vmem:[%s1379_s5 + $0xb0] sm:$0xf]  ;;  %v1070_v63 = vld [vmem:[%s1379_s5 + $0x54] sm:$0xf] }
  0x23   : > { %1200 = vmatpush.bf16.msra.mxu2 %v1095_v11  ;;  %v1083_v60 = vld [vmem:[%s1379_s5 + $0xb4] sm:$0xf0]  ;;  %v904_v61 = vor.u32 %v1067_v58, %v903_v57  ;;  %v921_v0 = vld [vmem:[%s1379_s5 + $0x58] sm:$0xf0]  ;;  %v1088_v2 = vld [vmem:[%s1379_s5 + $0xe4] sm:$0xf] }
  0x24   : > { %v968_v62 = vor.u32 %v1083_v60, %v967_v59  ;;  %v924_v1 = vor.u32 %v1070_v63, %v921_v0  ;;  %v993_v3 = vld [vmem:[%s1379_s5 + $0xe8] sm:$0xf0]  ;;  %v911_v5 = vld [vmem:[%s1379_s5 + $0x40] sm:$0xf]  ;;  %v1069_v6 = vld [vmem:[%s1379_s5 + $0x44] sm:$0xf0] }
  0x25   : > { %v996_v4 = vor.u32 %v1088_v2, %v993_v3  ;;  %v975_v7 = vld [vmem:[%s1379_s5 + $0xc0] sm:$0xf]  ;;  %v1085_v8 = vld [vmem:[%s1379_s5 + $0xc4] sm:$0xf0]  ;;  %v912_v9 = vor.u32 %v1069_v6, %v911_v5  ;;  %v1072_v11 = vld [vmem:[%s1379_s5 + $0x64] sm:$0xf] }
  0x26   : > { %516 = vmatpush.bf16.msra.mxu0 %v1094_v15  ;;  %v976_v10 = vor.u32 %v1085_v8, %v975_v7  ;;  %v929_v12 = vld [vmem:[%s1379_s5 + $0x68] sm:$0xf0]  ;;  %v1071_v17 = vld [vmem:[%s1379_s5 + $0x54] sm:$0xf0]  ;;  %v1074_v23 = vld [vmem:[%s1379_s5 + $0x74] sm:$0xf] }
  0x27   : > { %1201 = vmatpush.bf16.msra.mxu2 %v1094_v15  ;;  %v932_v13 = vor.u32 %v1072_v11, %v929_v12  ;;  %v1001_v15 = vld [vmem:[%s1379_s5 + $0xf8] sm:$0xf0]  ;;  %v1073_v27 = vld [vmem:[%s1379_s5 + $0x64] sm:$0xf0]  ;;  %v991_v28 = vld [vmem:[%s1379_s5 + $0xe0] sm:$0xf] }
  0x28   : > { %v937_v24 = vld [vmem:[%s1379_s5 + $0x78] sm:$0xf0]  ;;  %v945_v33 = vld [vmem:[%s1379_s5 + $0x88] sm:$0xf0]  ;;  %v935_v36 = vld [vmem:[%s1379_s5 + $0x70] sm:$0xf] }
  0x29   : > { %v999_v39 = vld [vmem:[%s1379_s5 + $0xf0] sm:$0xf]  ;;  %v1091_v40 = vld [vmem:[%s1379_s5 + $0xf4] sm:$0xf0]  ;;  %v1461_v47 = vld [vmem:[#allocation4] ss:$0 sm:$0xff] }
  0x2a   : > { %1042 = vmatmul.msk.bf16.gmra.mxu1 %vm462_vm0, %v892_v14  ;;  %517 = vmatpush.bf16.msra.mxu0 %v1093_v16  ;;  %v1090_v14 = vld [vmem:[%s1379_s5 + $0xf4] sm:$0xf]  ;;  %v1000_v42 = vor.u32 %v1091_v40, %v999_v39 }
  0x2b   : > { %1051 = vmatmul.msk.bf16.gmra.mxu3 %vm462_vm0, %v964_v19  ;;  %1202 = vmatpush.bf16.msra.mxu2 %v1093_v16  ;;  %v919_v16 = vld [vmem:[%s1379_s5 + $0x50] sm:$0xf]  ;;  %v1004_v18 = vor.u32 %v1090_v14, %v1001_v15 }
  0x2c   : > { %v983_v19 = vld [vmem:[%s1379_s5 + $0xd0] sm:$0xf]  ;;  %v920_v21 = vor.u32 %v1071_v17, %v919_v16 }
  0x2e   : > { %518 = vmatpush.bf16.msra.mxu0 %v1092_v20 }
  0x2f   : > { %1203 = vmatpush.bf16.msra.mxu2 %v1092_v20  ;;  %v1087_v20 = vld [vmem:[%s1379_s5 + $0xd4] sm:$0xf0] }
  0x30   : > { %v984_v22 = vor.u32 %v1087_v20, %v983_v19 }
  0x31   : > { %519 = vmatmul.bf16.vlgmr.msra.gmra.mxu0 %v880_v25  ;;  %v940_v25 = vor.u32 %v1074_v23, %v937_v24 }
  0x32   : > { %559 = vmatmul.bf16.vlgmr.msra.gmra.mxu2 %v944_v26  ;;  %v927_v26 = vld [vmem:[%s1379_s5 + $0x60] sm:$0xf] }
  0x33   : > { %v928_v30 = vor.u32 %v1073_v27, %v927_v26 }
  0x3a   : > { %1043 = vmatmul.msk.bf16.gmra.mxu1 %vm462_vm0, %v900_v29  ;;  %v1089_v29 = vld [vmem:[%s1379_s5 + $0xe4] sm:$0xf0] }
  0x3b   : > { %1052 = vmatmul.msk.bf16.gmra.mxu3 %vm462_vm0, %v972_v32  ;;  %v992_v31 = vor.u32 %v1089_v29, %v991_v28  ;;  %v1076_v32 = vld [vmem:[%s1379_s5 + $0x84] sm:$0xf] }
  0x3c   : > { %v948_v34 = vor.u32 %v1076_v32, %v945_v33 }
  0x41   : > { %524 = vmatmul.bf16.gmra.mxu0 %v888_v37  ;;  %v1075_v37 = vld [vmem:[%s1379_s5 + $0x74] sm:$0xf0] }
  0x42   : > { %564 = vmatmul.bf16.gmra.mxu2 %v952_v38 }
  0x4a   : > { %1044 = vmatmul.msk.bf16.gmra.mxu1 %vm462_vm0, %v908_v41  ;;  %v936_v41 = vor.u32 %v1075_v37, %v935_v36 }
  0x4b   : > { %1053 = vmatmul.msk.bf16.gmra.mxu3 %vm462_vm0, %v980_v44 }
  0x51   : > { %529 = vmatmul.bf16.gmra.mxu0 %v896_v49 }
  0x52   : > { %569 = vmatmul.bf16.gmra.mxu2 %v960_v50 }
  0x5a   : > { %1045 = vmatmul.msk.bf16.gmra.mxu1 %vm462_vm0, %v916_v53 }
  0x5b   : > { %1054 = vmatmul.msk.bf16.gmra.mxu3 %vm462_vm0, %v988_v56 }
  0x61   : > { %534 = vmatmul.bf16.gmra.mxu0 %v904_v61 }
  0x62   : > { %574 = vmatmul.bf16.gmra.mxu2 %v968_v62 }
  0x6a   : > { %1046 = vmatmul.msk.bf16.gmra.mxu1 %vm462_vm0, %v924_v1 }
  0x6b   : > { %1055 = vmatmul.msk.bf16.gmra.mxu3 %vm462_vm0, %v996_v4 }
  0x71   : > { %539 = vmatmul.bf16.gmra.mxu0 %v912_v9 }
  0x72   : > { %579 = vmatmul.bf16.gmra.mxu2 %v976_v10 }
  0x7a   : > { %1047 = vmatmul.msk.bf16.gmra.mxu1 %vm462_vm0, %v932_v13 }
  0x7b   : > { %1056 = vmatmul.msk.bf16.gmra.mxu3 %vm462_vm0, %v1004_v18 }
  0x81   : > { %544 = vmatmul.bf16.gmra.mxu0 %v920_v21 }
  0x82   : > { %584 = vmatmul.bf16.gmra.mxu2 %v984_v22 }
  0x8a   : > { %1048 = vmatmul.msk.bf16.gmra.mxu1 %vm462_vm0, %v940_v25 }
  0x91   : > { %549 = vmatmul.bf16.gmra.mxu0 %v928_v30 }
  0x92   : > { %589 = vmatmul.bf16.gmra.mxu2 %v992_v31 }
  0x97   : > { %v609_v35 = vpop.f32.mrf.mxu1 }
  0x9a   : > { %1049 = vmatmul.msk.bf16.gmra.mxu1 %vm462_vm0, %v948_v34 }
  0x9e   : > { %v654_v45 = vpop.f32.mrf.mxu3 }
  0x9f   : > { %v611_v38 = vpop.f32.mrf.mxu1 }
  0xa1   : > { %554 = vmatmul.bf16.gmra.mxu0 %v936_v41 }
  0xa2   : > { %594 = vmatmul.bf16.gmra.mxu2 %v1000_v42 }
  0xa6   : > { %v656_v54 = vpop.f32.mrf.mxu3 }
  0xa7   : > { %v614_v43 = vpop.f32.mrf.mxu1 }
  0xae   : > { %v520_v46 = vpop.f32.mrf.mxu0  ;;  %v659_v62 = vpop.f32.mrf.mxu3 }
  0xaf   : > { %v616_v44 = vpop.f32.mrf.mxu1  ;;  %v521_v48 = vadd.f32 %v1461_v47, %v520_v46 }
  0xb1   : > { %v610_v52 = vadd.f32 %v609_v35, %v521_v48 }
  0xb3   : > { %v689_v56 = vmax.f32 %v610_v52, 0.0 }
  0xb5   : > { %v1464_v50 = vpop.f32.mrf.mxu2 }
  0xb6   : > { %v522_v51 = vpop.f32.mrf.mxu0  ;;  %v661_v10 = vpop.f32.mrf.mxu3 }
  0xb7   : > { %v619_v49 = vpop.f32.mrf.mxu1  ;;  %v523_v53 = vadd.f32 %v1461_v47, %v522_v51 }
  0xb9   : > { %v612_v55 = vadd.f32 %v611_v38, %v523_v53 }
  0xbb   : > { %v690_v57 = vmax.f32 %v612_v55, 0.0 }
  0xbd   : > { %v1104_v59 = vpack.c.bf16 %v690_v57, %v689_v56  ;;  %v1473_v60 = vpop.f32.mrf.mxu2 }
  0xbe   : > { %v525_v61 = vpop.f32.mrf.mxu0  ;;  %v664_v23 = vpop.f32.mrf.mxu3 }
  0xbf   : > { %v621_v58 = vpop.f32.mrf.mxu1  ;;  %1105 = vst [vmem:[%s1471_s9] sm:$0xff] %v1104_v59   ;;  %v526_v63 = vadd.f32 %v1461_v47, %v525_v61 }
  0xc1   : > { %v615_v3 = vadd.f32 %v614_v43, %v526_v63 }
  0xc3   : > { %v691_v7 = vmax.f32 %v615_v3, 0.0 }
  0xc5   : > { %v565_v1 = vpop.f32.mrf.mxu2 }
  0xc6   : > { %v527_v2 = vpop.f32.mrf.mxu0  ;;  %v566_v6 = vadd.f32 %v1461_v47, %v565_v1  ;;  %v666_v37 = vpop.f32.mrf.mxu3 }
  0xc7   : > { %v624_v0 = vpop.f32.mrf.mxu1  ;;  %v528_v4 = vadd.f32 %v1461_v47, %v527_v2 }
  0xc8   : > { %v655_v13 = vadd.f32 %v654_v45, %v566_v6 }
  0xc9   : > { %v617_v5 = vadd.f32 %v616_v44, %v528_v4 }
  0xca   : > { %v707_v17 = vmax.f32 %v655_v13, 0.0 }
  0xcb   : > { %v692_v8 = vmax.f32 %v617_v5, 0.0 }
  0xcd   : > { %v1109_v11 = vpack.c.bf16 %v692_v8, %v691_v7  ;;  %v567_v12 = vpop.f32.mrf.mxu2 }
  0xce   : > { %v568_v14 = vadd.f32 %v1461_v47, %v567_v12  ;;  %v530_v15 = vpop.f32.mrf.mxu0  ;;  %v669_v51 = vpop.f32.mrf.mxu3 }
  0xcf   : > { %v626_v9 = vpop.f32.mrf.mxu1  ;;  %1181 = vst [vmem:[%s1471_s9 + $0x8] sm:$0xff] %v1109_v11   ;;  %v531_v19 = vadd.f32 %v1461_v47, %v530_v15 }
  0xd0   : > { %v657_v16 = vadd.f32 %v656_v54, %v568_v14 }
  0xd1   : > { %v620_v25 = vadd.f32 %v619_v49, %v531_v19 }
  0xd2   : > { %v708_v18 = vmax.f32 %v657_v16, 0.0 }
  0xd3   : > { %v693_v29 = vmax.f32 %v620_v25, 0.0 }
  0xd4   : > { %v1149_v21 = vpack.c.bf16 %v708_v18, %v707_v17 }
  0xd5   : > { %v570_v22 = vpop.f32.mrf.mxu2 }
  0xd6   : > { %1189 = vst [vmem:[%s1471_s9 + $0x48] sm:$0xff] %v1149_v21   ;;  %v532_v24 = vpop.f32.mrf.mxu0  ;;  %v571_v28 = vadd.f32 %v1461_v47, %v570_v22  ;;  %v671_v3 = vpop.f32.mrf.mxu3 }
  0xd7   : > { %v629_v20 = vpop.f32.mrf.mxu1  ;;  %v533_v26 = vadd.f32 %v1461_v47, %v532_v24 }
  0xd8   : > { %v660_v34 = vadd.f32 %v659_v62, %v571_v28 }
  0xd9   : > { %v622_v27 = vadd.f32 %v621_v58, %v533_v26 }
  0xda   : > { %v709_v39 = vmax.f32 %v660_v34, 0.0 }
  0xdb   : > { %v694_v30 = vmax.f32 %v622_v27, 0.0 }
  0xdd   : > { %v1114_v32 = vpack.c.bf16 %v694_v30, %v693_v29  ;;  %v572_v33 = vpop.f32.mrf.mxu2 }
  0xde   : > { %v573_v35 = vadd.f32 %v1461_v47, %v572_v33  ;;  %v535_v36 = vpop.f32.mrf.mxu0  ;;  %v674_v16 = vpop.f32.mrf.mxu3 }
  0xdf   : > { %v631_v31 = vpop.f32.mrf.mxu1  ;;  %1182 = vst [vmem:[%s1471_s9 + $0x10] sm:$0xff] %v1114_v32   ;;  %v536_v41 = vadd.f32 %v1461_v47, %v535_v36 }
  0xe0   : > { %v662_v38 = vadd.f32 %v661_v10, %v573_v35 }
  0xe1   : > { %v625_v46 = vadd.f32 %v624_v0, %v536_v41 }
  0xe2   : > { %v710_v40 = vmax.f32 %v662_v38, 0.0 }
  0xe3   : > { %v695_v53 = vmax.f32 %v625_v46, 0.0 }
  0xe4   : > { %v1154_v43 = vpack.c.bf16 %v710_v40, %v709_v39 }
  0xe5   : > { %v575_v44 = vpop.f32.mrf.mxu2 }
  0xe6   : > { %1190 = vst [vmem:[%s1471_s9 + $0x50] sm:$0xff] %v1154_v43   ;;  %v537_v45 = vpop.f32.mrf.mxu0  ;;  %v576_v52 = vadd.f32 %v1461_v47, %v575_v44  ;;  %v676_v30 = vpop.f32.mrf.mxu3 }
  0xe7   : > { %v634_v42 = vpop.f32.mrf.mxu1  ;;  %v538_v48 = vadd.f32 %v1461_v47, %v537_v45 }
  0xe8   : > { %v665_v58 = vadd.f32 %v664_v23, %v576_v52 }
  0xe9   : > { %v627_v49 = vadd.f32 %v626_v9, %v538_v48 }
  0xea   : > { %v711_v63 = vmax.f32 %v665_v58, 0.0 }
  0xeb   : > { %v696_v54 = vmax.f32 %v627_v49, 0.0 }
  0xed   : > { %v1119_v56 = vpack.c.bf16 %v696_v54, %v695_v53  ;;  %v577_v57 = vpop.f32.mrf.mxu2  ;;  %v561_v54 = vadd.f32 %v1461_v47, %v1464_v50 }
  0xee   : > { %v578_v59 = vadd.f32 %v1461_v47, %v577_v57  ;;  %v540_v61 = vpop.f32.mrf.mxu0  ;;  %v679_v43 = vpop.f32.mrf.mxu3 }
  0xef   : > { %v636_v55 = vpop.f32.mrf.mxu1  ;;  %1183 = vst [vmem:[%s1471_s9 + $0x18] sm:$0xff] %v1119_v56   ;;  %v541_v1 = vadd.f32 %v1461_v47, %v540_v61  ;;  %v563_v56 = vadd.f32 %v1461_v47, %v1473_v60 }
  0xf0   : > { %v667_v62 = vadd.f32 %v666_v37, %v578_v59 }
  0xf1   : > { %v630_v7 = vadd.f32 %v629_v20, %v541_v1 }
  0xf2   : > { %v712_v0 = vmax.f32 %v667_v62, 0.0 }
  0xf3   : > { %v697_v11 = vmax.f32 %v630_v7, 0.0 }
  0xf4   : > { %v1159_v4 = vpack.c.bf16 %v712_v0, %v711_v63 }
  0xf5   : > { %v580_v5 = vpop.f32.mrf.mxu2 }
  0xf6   : > { %1191 = vst [vmem:[%s1471_s9 + $0x58] sm:$0xff] %v1159_v4   ;;  %v542_v6 = vpop.f32.mrf.mxu0  ;;  %v581_v10 = vadd.f32 %v1461_v47, %v580_v5  ;;  %v681_v62 = vpop.f32.mrf.mxu3 }
  0xf7   : > { %v639_v2 = vpop.f32.mrf.mxu1  ;;  %v543_v8 = vadd.f32 %v1461_v47, %v542_v6 }
  0xf8   : > { %v670_v17 = vadd.f32 %v669_v51, %v581_v10 }
  0xf9   : > { %v632_v9 = vadd.f32 %v631_v31, %v543_v8 }
  0xfa   : > { %v713_v22 = vmax.f32 %v670_v17, 0.0 }
  0xfb   : > { %v698_v12 = vmax.f32 %v632_v9, 0.0 }
  0xfd   : > { %v1124_v14 = vpack.c.bf16 %v698_v12, %v697_v11  ;;  %v582_v15 = vpop.f32.mrf.mxu2 }
  0xfe   : > { %v583_v18 = vadd.f32 %v1461_v47, %v582_v15  ;;  %v545_v19 = vpop.f32.mrf.mxu0  ;;  %v684_v12 = vpop.f32.mrf.mxu3 }
  0xff   : > { %v641_v13 = vpop.f32.mrf.mxu1  ;;  %1184 = vst [vmem:[%s1471_s9 + $0x20] sm:$0xff] %v1124_v14   ;;  %v546_v23 = vadd.f32 %v1461_v47, %v545_v19 }
 0x100   : > { %v672_v21 = vadd.f32 %v671_v3, %v583_v18 }
 0x101   : > { %v635_v28 = vadd.f32 %v634_v42, %v546_v23 }
 0x102   : > { %v714_v20 = vmax.f32 %v672_v21, 0.0 }
 0x103   : > { %v699_v33 = vmax.f32 %v635_v28, 0.0 }
 0x104   : > { %v1164_v25 = vpack.c.bf16 %v714_v20, %v713_v22 }
 0x105   : > { %v585_v26 = vpop.f32.mrf.mxu2 }
 0x106   : > { %1192 = vst [vmem:[%s1471_s9 + $0x60] sm:$0xff] %v1164_v25   ;;  %v547_v27 = vpop.f32.mrf.mxu0  ;;  %v586_v32 = vadd.f32 %v1461_v47, %v585_v26  ;;  %v686_v26 = vpop.f32.mrf.mxu3 }
 0x107   : > { %v644_v24 = vpop.f32.mrf.mxu1  ;;  %v548_v29 = vadd.f32 %v1461_v47, %v547_v27 }
 0x108   : > { %v675_v38 = vadd.f32 %v674_v16, %v586_v32 }
 0x109   : > { %v637_v31 = vadd.f32 %v636_v55, %v548_v29 }
 0x10a   : > { %v715_v42 = vmax.f32 %v675_v38, 0.0 }
 0x10b   : > { %v700_v34 = vmax.f32 %v637_v31, 0.0 }
 0x10d   : > { %v1129_v36 = vpack.c.bf16 %v700_v34, %v699_v33  ;;  %v587_v37 = vpop.f32.mrf.mxu2 }
 0x10e   : > { %v588_v39 = vadd.f32 %v1461_v47, %v587_v37  ;;  %v550_v40 = vpop.f32.mrf.mxu0 }
 0x10f   : > { %v646_v35 = vpop.f32.mrf.mxu1  ;;  %1185 = vst [vmem:[%s1471_s9 + $0x28] sm:$0xff] %v1129_v36   ;;  %v551_v45 = vadd.f32 %v1461_v47, %v550_v40 }
 0x110   : > { %v677_v41 = vadd.f32 %v676_v30, %v588_v39 }
 0x111   : > { %v640_v52 = vadd.f32 %v639_v2, %v551_v45 }
 0x112   : > { %v716_v44 = vmax.f32 %v677_v41, 0.0 }
 0x113   : > { %v701_v59 = vmax.f32 %v640_v52, 0.0 }
 0x114   : > { %v1169_v48 = vpack.c.bf16 %v716_v44, %v715_v42 }
 0x115   : > { %v590_v49 = vpop.f32.mrf.mxu2 }
 0x116   : > { %1193 = vst [vmem:[%s1471_s9 + $0x68] sm:$0xff] %v1169_v48   ;;  %v552_v51 = vpop.f32.mrf.mxu0  ;;  %v591_v58 = vadd.f32 %v1461_v47, %v590_v49 }
 0x117   : > { %v649_v46 = vpop.f32.mrf.mxu1  ;;  %v553_v53 = vadd.f32 %v1461_v47, %v552_v51 }
 0x118   : > { %v650_v57 = vadd.f32 %v649_v46, %v561_v54  ;;  %v680_v4 = vadd.f32 %v679_v43, %v591_v58 }
 0x119   : > { %v642_v55 = vadd.f32 %v641_v13, %v553_v53 }
 0x11a   : > { %v705_v3 = vmax.f32 %v650_v57, 0.0  ;;  %v717_v8 = vmax.f32 %v680_v4, 0.0 }
 0x11b   : > { %v702_v61 = vmax.f32 %v642_v55, 0.0 }
 0x11d   : > { %v1134_v1 = vpack.c.bf16 %v702_v61, %v701_v59  ;;  %v592_v2 = vpop.f32.mrf.mxu2 }
 0x11e   : > { %v593_v5 = vadd.f32 %v1461_v47, %v592_v2  ;;  %v555_v6 = vpop.f32.mrf.mxu0 }
 0x11f   : > { %v651_v63 = vpop.f32.mrf.mxu1  ;;  %1186 = vst [vmem:[%s1471_s9 + $0x30] sm:$0xff] %v1134_v1   ;;  %v556_v10 = vadd.f32 %v1461_v47, %v555_v6 }
 0x120   : > { %v652_v0 = vadd.f32 %v651_v63, %v563_v56  ;;  %v682_v7 = vadd.f32 %v681_v62, %v593_v5 }
 0x121   : > { %v645_v15 = vadd.f32 %v644_v24, %v556_v10 }
 0x122   : > { %v706_v50 = vmax.f32 %v652_v0, 0.0  ;;  %v718_v9 = vmax.f32 %v682_v7, 0.0 }
 0x123   : > { %v703_v19 = vmax.f32 %v645_v15, 0.0 }
 0x124   : > { %v1144_v60 = vpack.c.bf16 %v706_v50, %v705_v3  ;;  %v1174_v11 = vpack.c.bf16 %v718_v9, %v717_v8 }
 0x125   : > { %v595_v13 = vpop.f32.mrf.mxu2 }
 0x126   : > { %1188 = vst [vmem:[%s1471_s9 + $0x40] sm:$0xff] %v1144_v60   ;;  %v557_v14 = vpop.f32.mrf.mxu0  ;;  %v596_v18 = vadd.f32 %v1461_v47, %v595_v13 }
 0x127   : > { %1194 = vst [vmem:[%s1471_s9 + $0x70] sm:$0xff] %v1174_v11   ;;  %v558_v16 = vadd.f32 %v1461_v47, %v557_v14 }
 0x128   : > { %v685_v23 = vadd.f32 %v684_v12, %v596_v18 }
 0x129   : > { %v647_v17 = vadd.f32 %v646_v35, %v558_v16 }
 0x12a   : > { %v719_v28 = vmax.f32 %v685_v23, 0.0 }
 0x12b   : > { %v704_v21 = vmax.f32 %v647_v17, 0.0 }
 0x12d   : > { %v1139_v22 = vpack.c.bf16 %v704_v21, %v703_v19  ;;  %v597_v20 = vpop.f32.mrf.mxu2 }
 0x12e   : > { %v598_v25 = vadd.f32 %v1461_v47, %v597_v20 }
 0x12f   : > { %1187 = vst [vmem:[%s1471_s9 + $0x38] sm:$0xff] %v1139_v22  }
 0x130   : > { %v687_v27 = vadd.f32 %v686_v26, %v598_v25 }
 0x132   : > { %v720_v29 = vmax.f32 %v687_v27, 0.0 }
 0x134   : > { %v1179_v30 = vpack.c.bf16 %v720_v29, %v719_v28 }
 0x136   : > { %1195 = vst [vmem:[%s1471_s9 + $0x78] sm:$0xff] %v1179_v30  }
 0x137 PF: > { %s15_s12 = sadd.s32 1, %s1311_s12  }
 0x138   : > { %p12_p7 = scmp.ge.s32.totalorder %s15_s12, 4  }
 0x13a   :  { %14 = sbr.rel (!%p12_p7) target bundleno = 2 (0x2), region = 71 }
 0x13f   :  { %807 = vsyncpa [#allocation3], 1 }
 0x140   :  { %809 = vsyncpa [#allocation3 + $0x1], 1 }
 0x141   :  { %810 = vsyncpa [#allocation5], 1 }

// kernel: _lambda_.9
= control target key start
LH: loop header
LB: loop body
LE: loop exit
PB: predicated region body
PF: predicated region fallthrough
CT: control target
= control target key end

     0   :  { %s1296_s12 = smov 0   ;;  %s1533_s0 = inlined_call_operand.vmem [shape: bf16[2048,72], index: 0, kind: input, shape index: {}]   ;;  %s1534_s1 = inlined_call_operand.vmem [shape: bf16[72,128], index: 1, kind: input, shape index: {}]   ;;  %s1535_s2 = inlined_call_operand.vmem [shape: f32[1,128], index: 2, kind: input, shape index: {}]   ;;  %s1536_s3 = inlined_call_operand.vmem [shape: f32[2048,128], index: 3, kind: output, shape index: {}]  }
   0x1 LB: > { %s893_s13 = sadd.s32 4294967295, %s1274_s12   ;;  %p897_p0 = scmp.ge.s32.totalorder %s1274_s12, 1  ;;  %s1274_s12 = sphi %s1296_s12, %s13_s12  }
   0x2   : > { %p138_p1 = scmp.lt.s32.totalorder %s1274_s12, 5 }
   0x4   : > { %p139_p2 = pnand %p897_p0, %p138_p1 }
   0x5   : > { %s898_s16 = sshll.u32 (!%p139_p2), %s893_s13, 6 }
   0x6   : > { %142 = sbr.rel (%p139_p2) target bundleno = 300 (0x12c), region = 32  ;;  %p163_p3 = scmp.lt.s32.totalorder (!%p139_p2), %s898_s16, 255 }
   0xb   : > { %v247_v0 = vld [vmem:[%s1534_s1 + $0x20] sm:$0xf]  ;;  %vm536_vm0 = vcmask 1043456   ;;  %v1115_v4 = vld [vmem:[%s1534_s1 + $0x18] sm:$0xff]  ;;  %v1114_v5 = vld [vmem:[%s1534_s1 + $0x10] sm:$0xff]  ;;  %s1538_s16 = smov (!%p163_p3, %s898_s16), 255 }
   0xc   : > { %v429_v1 = vunpack.c.l.b16 %v247_v0  ;;  %v1113_v6 = vld [vmem:[%s1534_s1 + $0x8] sm:$0xff]  ;;  %s899_s23 = sshll.u32 %s1538_s16, 2  ;;  %v1112_v7 = vld [vmem:[%s1534_s1] sm:$0xff]  ;;  %vm439_vm1 = vcmask 588800   ;;  %s901_s4 = sshll.u32 %s1538_s16, 3 }
   0xd   : > { %s1325_s28 = scalar_lea.vmem %s1533_s0, %s899_s23  ;;  %v1394_v40 = vld [vmem:[%s1535_s2] ss:$0 sm:$0xff]  ;;  %s1402_s7 = scalar_lea.vmem %s1536_s3, %s901_s4 }
   0xe   : > { %v434_v2 = vpack.c.b16 %v429_v1, %v429_v1  ;;  %v1080_v8 = vld [vmem:[%s1325_s28] sm:$0xff]  ;;  %v1081_v12 = vld [vmem:[%s1325_s28 + $0x8] sm:$0xff]  ;;  %v1082_v16 = vld [vmem:[%s1325_s28 + $0x10] sm:$0xff] }
   0xf   : > { %v1088_v9 = vld [vmem:[%s1325_s28 + $0x40] sm:$0xff]  ;;  %v1089_v13 = vld [vmem:[%s1325_s28 + $0x48] sm:$0xff]  ;;  %v1090_v17 = vld [vmem:[%s1325_s28 + $0x50] sm:$0xff] }
  0x10   : > { %v538_v3 = vsel %vm536_vm0, %v434_v2, 0  ;;  %v1096_v10 = vld [vmem:[%s1325_s28 + $0x80] sm:$0xff]  ;;  %v1097_v14 = vld [vmem:[%s1325_s28 + $0x88] sm:$0xff]  ;;  %v1098_v18 = vld [vmem:[%s1325_s28 + $0x90] sm:$0xff] }
  0x11   : > { %543 = vmatpush.bf16.msra.mxu0 %v538_v3  ;;  %1116 = vmatpush.bf16.msra.mxu1 %v538_v3  ;;  %v1104_v11 = vld [vmem:[%s1325_s28 + $0xc0] sm:$0xff]  ;;  %v1105_v15 = vld [vmem:[%s1325_s28 + $0xc8] sm:$0xff]  ;;  %v1106_v19 = vld [vmem:[%s1325_s28 + $0xd0] sm:$0xff] }
  0x12   : > { %1117 = vmatpush.bf16.msra.mxu2 %v538_v3  ;;  %1118 = vmatpush.bf16.msra.mxu3 %v538_v3  ;;  %v1083_v20 = vld [vmem:[%s1325_s28 + $0x18] sm:$0xff]  ;;  %v1084_v24 = vld [vmem:[%s1325_s28 + $0x20] sm:$0xff]  ;;  %v1085_v28 = vld [vmem:[%s1325_s28 + $0x28] sm:$0xff] }
  0x13   : > { %v1091_v21 = vld [vmem:[%s1325_s28 + $0x58] sm:$0xff]  ;;  %v1092_v25 = vld [vmem:[%s1325_s28 + $0x60] sm:$0xff]  ;;  %v1093_v29 = vld [vmem:[%s1325_s28 + $0x68] sm:$0xff] }
  0x14   : > { %v1099_v22 = vld [vmem:[%s1325_s28 + $0x98] sm:$0xff]  ;;  %v1100_v26 = vld [vmem:[%s1325_s28 + $0xa0] sm:$0xff]  ;;  %v1101_v30 = vld [vmem:[%s1325_s28 + $0xa8] sm:$0xff] }
  0x15   : > { %544 = vmatpush.bf16.msra.mxu0 %v1115_v4  ;;  %1119 = vmatpush.bf16.msra.mxu1 %v1115_v4  ;;  %v1107_v23 = vld [vmem:[%s1325_s28 + $0xd8] sm:$0xff]  ;;  %v1108_v27 = vld [vmem:[%s1325_s28 + $0xe0] sm:$0xff]  ;;  %v1109_v31 = vld [vmem:[%s1325_s28 + $0xe8] sm:$0xff] }
  0x16   : > { %1120 = vmatpush.bf16.msra.mxu2 %v1115_v4  ;;  %1121 = vmatpush.bf16.msra.mxu3 %v1115_v4  ;;  %v1086_v32 = vld [vmem:[%s1325_s28 + $0x30] sm:$0xff]  ;;  %v1087_v36 = vld [vmem:[%s1325_s28 + $0x38] sm:$0xff] }
  0x17   : > { %v1094_v33 = vld [vmem:[%s1325_s28 + $0x70] sm:$0xff]  ;;  %v1095_v37 = vld [vmem:[%s1325_s28 + $0x78] sm:$0xff] }
  0x18   : > { %v1102_v34 = vld [vmem:[%s1325_s28 + $0xb0] sm:$0xff]  ;;  %v1103_v38 = vld [vmem:[%s1325_s28 + $0xb8] sm:$0xff] }
  0x19   : > { %545 = vmatpush.bf16.msra.mxu0 %v1114_v5  ;;  %1122 = vmatpush.bf16.msra.mxu1 %v1114_v5  ;;  %v1110_v35 = vld [vmem:[%s1325_s28 + $0xf0] sm:$0xff]  ;;  %v1111_v39 = vld [vmem:[%s1325_s28 + $0xf8] sm:$0xff] }
  0x1a   : > { %1123 = vmatpush.bf16.msra.mxu2 %v1114_v5  ;;  %1124 = vmatpush.bf16.msra.mxu3 %v1114_v5 }
  0x1d   : > { %546 = vmatpush.bf16.msra.mxu0 %v1113_v6  ;;  %1125 = vmatpush.bf16.msra.mxu1 %v1113_v6 }
  0x1e   : > { %1126 = vmatpush.bf16.msra.mxu2 %v1113_v6  ;;  %1127 = vmatpush.bf16.msra.mxu3 %v1113_v6 }
  0x21   : > { %547 = vmatpush.bf16.msra.mxu0 %v1112_v7  ;;  %1128 = vmatpush.bf16.msra.mxu1 %v1112_v7 }
  0x22   : > { %1129 = vmatpush.bf16.msra.mxu2 %v1112_v7  ;;  %1130 = vmatpush.bf16.msra.mxu3 %v1112_v7 }
  0x24   : > { %1046 = vmatmul.msk.bf16.vlgmr.msra.gmra.mxu0 %vm439_vm1, %v1080_v8  ;;  %1054 = vmatmul.msk.bf16.vlgmr.msra.gmra.mxu1 %vm439_vm1, %v1088_v9 }
  0x25   : > { %1062 = vmatmul.msk.bf16.vlgmr.msra.gmra.mxu2 %vm439_vm1, %v1096_v10  ;;  %1070 = vmatmul.msk.bf16.vlgmr.msra.gmra.mxu3 %vm439_vm1, %v1104_v11 }
  0x34   : > { %1047 = vmatmul.msk.bf16.gmra.mxu0 %vm439_vm1, %v1081_v12  ;;  %1055 = vmatmul.msk.bf16.gmra.mxu1 %vm439_vm1, %v1089_v13 }
  0x35   : > { %1063 = vmatmul.msk.bf16.gmra.mxu2 %vm439_vm1, %v1097_v14  ;;  %1071 = vmatmul.msk.bf16.gmra.mxu3 %vm439_vm1, %v1105_v15 }
  0x44   : > { %1048 = vmatmul.msk.bf16.gmra.mxu0 %vm439_vm1, %v1082_v16  ;;  %1056 = vmatmul.msk.bf16.gmra.mxu1 %vm439_vm1, %v1090_v17 }
  0x45   : > { %1064 = vmatmul.msk.bf16.gmra.mxu2 %vm439_vm1, %v1098_v18  ;;  %1072 = vmatmul.msk.bf16.gmra.mxu3 %vm439_vm1, %v1106_v19 }
  0x54   : > { %1049 = vmatmul.msk.bf16.gmra.mxu0 %vm439_vm1, %v1083_v20  ;;  %1057 = vmatmul.msk.bf16.gmra.mxu1 %vm439_vm1, %v1091_v21 }
  0x55   : > { %1065 = vmatmul.msk.bf16.gmra.mxu2 %vm439_vm1, %v1099_v22  ;;  %1073 = vmatmul.msk.bf16.gmra.mxu3 %vm439_vm1, %v1107_v23 }
  0x64   : > { %1050 = vmatmul.msk.bf16.gmra.mxu0 %vm439_vm1, %v1084_v24  ;;  %1058 = vmatmul.msk.bf16.gmra.mxu1 %vm439_vm1, %v1092_v25 }
  0x65   : > { %1066 = vmatmul.msk.bf16.gmra.mxu2 %vm439_vm1, %v1100_v26  ;;  %1074 = vmatmul.msk.bf16.gmra.mxu3 %vm439_vm1, %v1108_v27 }
  0x74   : > { %1051 = vmatmul.msk.bf16.gmra.mxu0 %vm439_vm1, %v1085_v28  ;;  %1059 = vmatmul.msk.bf16.gmra.mxu1 %vm439_vm1, %v1093_v29 }
  0x75   : > { %1067 = vmatmul.msk.bf16.gmra.mxu2 %vm439_vm1, %v1101_v30  ;;  %1075 = vmatmul.msk.bf16.gmra.mxu3 %vm439_vm1, %v1109_v31 }
  0x84   : > { %1052 = vmatmul.msk.bf16.gmra.mxu0 %vm439_vm1, %v1086_v32  ;;  %1060 = vmatmul.msk.bf16.gmra.mxu1 %vm439_vm1, %v1094_v33 }
  0x85   : > { %1068 = vmatmul.msk.bf16.gmra.mxu2 %vm439_vm1, %v1102_v34  ;;  %1076 = vmatmul.msk.bf16.gmra.mxu3 %vm439_vm1, %v1110_v35 }
  0x94   : > { %1053 = vmatmul.msk.bf16.gmra.mxu0 %vm439_vm1, %v1087_v36  ;;  %1061 = vmatmul.msk.bf16.gmra.mxu1 %vm439_vm1, %v1095_v37 }
  0x95   : > { %1069 = vmatmul.msk.bf16.gmra.mxu2 %vm439_vm1, %v1103_v38  ;;  %1077 = vmatmul.msk.bf16.gmra.mxu3 %vm439_vm1, %v1111_v39 }
  0xa1   : > { %v549_v41 = vpop.f32.mrf.mxu0  ;;  %v589_v42 = vpop.f32.mrf.mxu1 }
  0xa2   : > { %v550_v43 = vadd.f32 %v1394_v40, %v549_v41  ;;  %v590_v44 = vadd.f32 %v1394_v40, %v589_v42 }
  0xa4   : > { %1140 = vtanh.f32 %v550_v43 }
  0xa5   : > { %1142 = vtanh.f32 %v590_v44 }
  0xa8   : > { %v629_v45 = vpop.f32.mrf.mxu2  ;;  %v669_v46 = vpop.f32.mrf.mxu3 }
  0xa9   : > { %v630_v47 = vadd.f32 %v1394_v40, %v629_v45  ;;  %v670_v48 = vadd.f32 %v1394_v40, %v669_v46  ;;  %v551_v49 = vpop.f32.mrf.mxu0  ;;  %v591_v50 = vpop.f32.mrf.mxu1 }
  0xaa   : > { %v1141_v51 = vpop.eup %1140  ;;  %v552_v52 = vadd.f32 %v1394_v40, %v551_v49  ;;  %v592_v53 = vadd.f32 %v1394_v40, %v591_v50 }
  0xab   : > { %v1143_v54 = vpop.eup %1142  ;;  %773 = vst [vmem:[%s1402_s7] sm:$0xff] %v1141_v51  ;;  %1144 = vtanh.f32 %v630_v47 }
  0xac   : > { %789 = vst [vmem:[%s1402_s7 + $0x80] sm:$0xff] %v1143_v54  ;;  %1146 = vtanh.f32 %v670_v48 }
  0xad   : > { %1148 = vtanh.f32 %v552_v52 }
  0xae   : > { %1150 = vtanh.f32 %v592_v53 }
  0xb0   : > { %v631_v55 = vpop.f32.mrf.mxu2  ;;  %v671_v56 = vpop.f32.mrf.mxu3 }
  0xb1   : > { %v1145_v57 = vpop.eup %1144  ;;  %v632_v58 = vadd.f32 %v1394_v40, %v631_v55  ;;  %v672_v59 = vadd.f32 %v1394_v40, %v671_v56  ;;  %v554_v60 = vpop.f32.mrf.mxu0 }
  0xb2   : > { %v594_v61 = vpop.f32.mrf.mxu1  ;;  %v1147_v62 = vpop.eup %1146  ;;  %805 = vst [vmem:[%s1402_s7 + $0x100] sm:$0xff] %v1145_v57  ;;  %v555_v63 = vadd.f32 %v1394_v40, %v554_v60 }
  0xb3   : > { %v595_v0 = vadd.f32 %v1394_v40, %v594_v61  ;;  %v1149_v1 = vpop.eup %1148  ;;  %821 = vst [vmem:[%s1402_s7 + $0x180] sm:$0xff] %v1147_v62  ;;  %1152 = vtanh.f32 %v632_v58 }
  0xb4   : > { %v1151_v2 = vpop.eup %1150  ;;  %774 = vst [vmem:[%s1402_s7 + $0x8] sm:$0xff] %v1149_v1  ;;  %1154 = vtanh.f32 %v672_v59 }
  0xb5   : > { %790 = vst [vmem:[%s1402_s7 + $0x88] sm:$0xff] %v1151_v2  ;;  %1156 = vtanh.f32 %v555_v63 }
  0xb6   : > { %1158 = vtanh.f32 %v595_v0 }
  0xb8   : > { %v634_v3 = vpop.f32.mrf.mxu2  ;;  %v674_v4 = vpop.f32.mrf.mxu3 }
  0xb9   : > { %v1153_v5 = vpop.eup %1152  ;;  %v635_v6 = vadd.f32 %v1394_v40, %v634_v3  ;;  %v675_v7 = vadd.f32 %v1394_v40, %v674_v4  ;;  %v556_v8 = vpop.f32.mrf.mxu0 }
  0xba   : > { %v596_v9 = vpop.f32.mrf.mxu1  ;;  %v1155_v10 = vpop.eup %1154  ;;  %806 = vst [vmem:[%s1402_s7 + $0x108] sm:$0xff] %v1153_v5  ;;  %v557_v11 = vadd.f32 %v1394_v40, %v556_v8 }
  0xbb   : > { %v597_v12 = vadd.f32 %v1394_v40, %v596_v9  ;;  %v1157_v13 = vpop.eup %1156  ;;  %822 = vst [vmem:[%s1402_s7 + $0x188] sm:$0xff] %v1155_v10  ;;  %1160 = vtanh.f32 %v635_v6 }
  0xbc   : > { %v1159_v14 = vpop.eup %1158  ;;  %775 = vst [vmem:[%s1402_s7 + $0x10] sm:$0xff] %v1157_v13  ;;  %1162 = vtanh.f32 %v675_v7 }
  0xbd   : > { %791 = vst [vmem:[%s1402_s7 + $0x90] sm:$0xff] %v1159_v14  ;;  %1164 = vtanh.f32 %v557_v11 }
  0xbe   : > { %1166 = vtanh.f32 %v597_v12 }
  0xc0   : > { %v636_v15 = vpop.f32.mrf.mxu2  ;;  %v676_v16 = vpop.f32.mrf.mxu3 }
  0xc1   : > { %v1161_v17 = vpop.eup %1160  ;;  %v637_v18 = vadd.f32 %v1394_v40, %v636_v15  ;;  %v677_v19 = vadd.f32 %v1394_v40, %v676_v16  ;;  %v559_v20 = vpop.f32.mrf.mxu0 }
  0xc2   : > { %v599_v21 = vpop.f32.mrf.mxu1  ;;  %v1163_v22 = vpop.eup %1162  ;;  %807 = vst [vmem:[%s1402_s7 + $0x110] sm:$0xff] %v1161_v17  ;;  %v560_v23 = vadd.f32 %v1394_v40, %v559_v20 }
  0xc3   : > { %v600_v24 = vadd.f32 %v1394_v40, %v599_v21  ;;  %v1165_v25 = vpop.eup %1164  ;;  %823 = vst [vmem:[%s1402_s7 + $0x190] sm:$0xff] %v1163_v22  ;;  %1168 = vtanh.f32 %v637_v18 }
  0xc4   : > { %v1167_v26 = vpop.eup %1166  ;;  %776 = vst [vmem:[%s1402_s7 + $0x18] sm:$0xff] %v1165_v25  ;;  %1170 = vtanh.f32 %v677_v19 }
  0xc5   : > { %792 = vst [vmem:[%s1402_s7 + $0x98] sm:$0xff] %v1167_v26  ;;  %1172 = vtanh.f32 %v560_v23 }
  0xc6   : > { %1174 = vtanh.f32 %v600_v24 }
  0xc8   : > { %v639_v27 = vpop.f32.mrf.mxu2  ;;  %v679_v28 = vpop.f32.mrf.mxu3 }
  0xc9   : > { %v1169_v29 = vpop.eup %1168  ;;  %v640_v30 = vadd.f32 %v1394_v40, %v639_v27  ;;  %v680_v31 = vadd.f32 %v1394_v40, %v679_v28  ;;  %v561_v32 = vpop.f32.mrf.mxu0 }
  0xca   : > { %v601_v33 = vpop.f32.mrf.mxu1  ;;  %v1171_v34 = vpop.eup %1170  ;;  %808 = vst [vmem:[%s1402_s7 + $0x118] sm:$0xff] %v1169_v29  ;;  %v562_v35 = vadd.f32 %v1394_v40, %v561_v32 }
  0xcb   : > { %v602_v36 = vadd.f32 %v1394_v40, %v601_v33  ;;  %v1173_v37 = vpop.eup %1172  ;;  %824 = vst [vmem:[%s1402_s7 + $0x198] sm:$0xff] %v1171_v34  ;;  %1176 = vtanh.f32 %v640_v30 }
  0xcc   : > { %v1175_v38 = vpop.eup %1174  ;;  %777 = vst [vmem:[%s1402_s7 + $0x20] sm:$0xff] %v1173_v37  ;;  %1178 = vtanh.f32 %v680_v31 }
  0xcd   : > { %793 = vst [vmem:[%s1402_s7 + $0xa0] sm:$0xff] %v1175_v38  ;;  %1180 = vtanh.f32 %v562_v35 }
  0xce   : > { %1182 = vtanh.f32 %v602_v36 }
  0xd0   : > { %v641_v39 = vpop.f32.mrf.mxu2  ;;  %v681_v41 = vpop.f32.mrf.mxu3 }
  0xd1   : > { %v1177_v42 = vpop.eup %1176  ;;  %v642_v43 = vadd.f32 %v1394_v40, %v641_v39  ;;  %v682_v44 = vadd.f32 %v1394_v40, %v681_v41  ;;  %v564_v45 = vpop.f32.mrf.mxu0 }
  0xd2   : > { %v604_v46 = vpop.f32.mrf.mxu1  ;;  %v1179_v47 = vpop.eup %1178  ;;  %809 = vst [vmem:[%s1402_s7 + $0x120] sm:$0xff] %v1177_v42  ;;  %v565_v48 = vadd.f32 %v1394_v40, %v564_v45 }
  0xd3   : > { %v605_v49 = vadd.f32 %v1394_v40, %v604_v46  ;;  %v1181_v50 = vpop.eup %1180  ;;  %825 = vst [vmem:[%s1402_s7 + $0x1a0] sm:$0xff] %v1179_v47  ;;  %1184 = vtanh.f32 %v642_v43 }
  0xd4   : > { %v1183_v51 = vpop.eup %1182  ;;  %778 = vst [vmem:[%s1402_s7 + $0x28] sm:$0xff] %v1181_v50  ;;  %1186 = vtanh.f32 %v682_v44 }
  0xd5   : > { %794 = vst [vmem:[%s1402_s7 + $0xa8] sm:$0xff] %v1183_v51  ;;  %1188 = vtanh.f32 %v565_v48 }
  0xd6   : > { %1190 = vtanh.f32 %v605_v49 }
  0xd8   : > { %v644_v52 = vpop.f32.mrf.mxu2  ;;  %v684_v53 = vpop.f32.mrf.mxu3 }
  0xd9   : > { %v1185_v54 = vpop.eup %1184  ;;  %v645_v55 = vadd.f32 %v1394_v40, %v644_v52  ;;  %v685_v56 = vadd.f32 %v1394_v40, %v684_v53  ;;  %v566_v57 = vpop.f32.mrf.mxu0 }
  0xda   : > { %v606_v58 = vpop.f32.mrf.mxu1  ;;  %v1187_v59 = vpop.eup %1186  ;;  %810 = vst [vmem:[%s1402_s7 + $0x128] sm:$0xff] %v1185_v54  ;;  %v567_v60 = vadd.f32 %v1394_v40, %v566_v57 }
  0xdb   : > { %v607_v61 = vadd.f32 %v1394_v40, %v606_v58  ;;  %v1189_v62 = vpop.eup %1188  ;;  %826 = vst [vmem:[%s1402_s7 + $0x1a8] sm:$0xff] %v1187_v59  ;;  %1192 = vtanh.f32 %v645_v55 }
  0xdc   : > { %v1191_v63 = vpop.eup %1190  ;;  %779 = vst [vmem:[%s1402_s7 + $0x30] sm:$0xff] %v1189_v62  ;;  %1194 = vtanh.f32 %v685_v56 }
  0xdd   : > { %795 = vst [vmem:[%s1402_s7 + $0xb0] sm:$0xff] %v1191_v63  ;;  %1196 = vtanh.f32 %v567_v60 }
  0xde   : > { %1198 = vtanh.f32 %v607_v61 }
  0xe0   : > { %v646_v0 = vpop.f32.mrf.mxu2  ;;  %v686_v1 = vpop.f32.mrf.mxu3 }
  0xe1   : > { %v1193_v2 = vpop.eup %1192  ;;  %v647_v3 = vadd.f32 %v1394_v40, %v646_v0  ;;  %v687_v4 = vadd.f32 %v1394_v40, %v686_v1  ;;  %v569_v5 = vpop.f32.mrf.mxu0 }
  0xe2   : > { %v609_v6 = vpop.f32.mrf.mxu1  ;;  %v1195_v7 = vpop.eup %1194  ;;  %811 = vst [vmem:[%s1402_s7 + $0x130] sm:$0xff] %v1193_v2  ;;  %v570_v8 = vadd.f32 %v1394_v40, %v569_v5 }
  0xe3   : > { %v610_v9 = vadd.f32 %v1394_v40, %v609_v6  ;;  %v1197_v10 = vpop.eup %1196  ;;  %827 = vst [vmem:[%s1402_s7 + $0x1b0] sm:$0xff] %v1195_v7  ;;  %1200 = vtanh.f32 %v647_v3 }
  0xe4   : > { %v1199_v11 = vpop.eup %1198  ;;  %780 = vst [vmem:[%s1402_s7 + $0x38] sm:$0xff] %v1197_v10  ;;  %1202 = vtanh.f32 %v687_v4 }
  0xe5   : > { %796 = vst [vmem:[%s1402_s7 + $0xb8] sm:$0xff] %v1199_v11  ;;  %1204 = vtanh.f32 %v570_v8 }
  0xe6   : > { %1206 = vtanh.f32 %v610_v9 }
  0xe8   : > { %v649_v12 = vpop.f32.mrf.mxu2  ;;  %v689_v13 = vpop.f32.mrf.mxu3 }
  0xe9   : > { %v1201_v14 = vpop.eup %1200  ;;  %v650_v15 = vadd.f32 %v1394_v40, %v649_v12  ;;  %v690_v16 = vadd.f32 %v1394_v40, %v689_v13  ;;  %v571_v17 = vpop.f32.mrf.mxu0 }
  0xea   : > { %v611_v18 = vpop.f32.mrf.mxu1  ;;  %v1203_v19 = vpop.eup %1202  ;;  %812 = vst [vmem:[%s1402_s7 + $0x138] sm:$0xff] %v1201_v14  ;;  %v572_v20 = vadd.f32 %v1394_v40, %v571_v17 }
  0xeb   : > { %v612_v21 = vadd.f32 %v1394_v40, %v611_v18  ;;  %v1205_v22 = vpop.eup %1204  ;;  %828 = vst [vmem:[%s1402_s7 + $0x1b8] sm:$0xff] %v1203_v19  ;;  %1208 = vtanh.f32 %v650_v15 }
  0xec   : > { %v1207_v23 = vpop.eup %1206  ;;  %781 = vst [vmem:[%s1402_s7 + $0x40] sm:$0xff] %v1205_v22  ;;  %1210 = vtanh.f32 %v690_v16 }
  0xed   : > { %797 = vst [vmem:[%s1402_s7 + $0xc0] sm:$0xff] %v1207_v23  ;;  %1212 = vtanh.f32 %v572_v20 }
  0xee   : > { %1214 = vtanh.f32 %v612_v21 }
  0xf0   : > { %v651_v24 = vpop.f32.mrf.mxu2  ;;  %v691_v25 = vpop.f32.mrf.mxu3 }
  0xf1   : > { %v1209_v26 = vpop.eup %1208  ;;  %v652_v27 = vadd.f32 %v1394_v40, %v651_v24  ;;  %v692_v28 = vadd.f32 %v1394_v40, %v691_v25  ;;  %v574_v29 = vpop.f32.mrf.mxu0 }
  0xf2   : > { %v614_v30 = vpop.f32.mrf.mxu1  ;;  %v1211_v31 = vpop.eup %1210  ;;  %813 = vst [vmem:[%s1402_s7 + $0x140] sm:$0xff] %v1209_v26  ;;  %v575_v32 = vadd.f32 %v1394_v40, %v574_v29 }
  0xf3   : > { %v615_v33 = vadd.f32 %v1394_v40, %v614_v30  ;;  %v1213_v34 = vpop.eup %1212  ;;  %829 = vst [vmem:[%s1402_s7 + $0x1c0] sm:$0xff] %v1211_v31  ;;  %1216 = vtanh.f32 %v652_v27 }
  0xf4   : > { %v1215_v35 = vpop.eup %1214  ;;  %782 = vst [vmem:[%s1402_s7 + $0x48] sm:$0xff] %v1213_v34  ;;  %1218 = vtanh.f32 %v692_v28 }
  0xf5   : > { %798 = vst [vmem:[%s1402_s7 + $0xc8] sm:$0xff] %v1215_v35  ;;  %1220 = vtanh.f32 %v575_v32 }
  0xf6   : > { %1222 = vtanh.f32 %v615_v33 }
  0xf8   : > { %v654_v36 = vpop.f32.mrf.mxu2  ;;  %v694_v37 = vpop.f32.mrf.mxu3 }
  0xf9   : > { %v1217_v38 = vpop.eup %1216  ;;  %v655_v39 = vadd.f32 %v1394_v40, %v654_v36  ;;  %v695_v41 = vadd.f32 %v1394_v40, %v694_v37  ;;  %v576_v42 = vpop.f32.mrf.mxu0 }
  0xfa   : > { %v616_v43 = vpop.f32.mrf.mxu1  ;;  %v1219_v44 = vpop.eup %1218  ;;  %814 = vst [vmem:[%s1402_s7 + $0x148] sm:$0xff] %v1217_v38  ;;  %v577_v45 = vadd.f32 %v1394_v40, %v576_v42 }
  0xfb   : > { %v617_v46 = vadd.f32 %v1394_v40, %v616_v43  ;;  %v1221_v47 = vpop.eup %1220  ;;  %830 = vst [vmem:[%s1402_s7 + $0x1c8] sm:$0xff] %v1219_v44  ;;  %1224 = vtanh.f32 %v655_v39 }
  0xfc   : > { %v1223_v48 = vpop.eup %1222  ;;  %783 = vst [vmem:[%s1402_s7 + $0x50] sm:$0xff] %v1221_v47  ;;  %1226 = vtanh.f32 %v695_v41 }
  0xfd   : > { %799 = vst [vmem:[%s1402_s7 + $0xd0] sm:$0xff] %v1223_v48  ;;  %1228 = vtanh.f32 %v577_v45 }
  0xfe   : > { %1230 = vtanh.f32 %v617_v46 }
 0x100   : > { %v656_v49 = vpop.f32.mrf.mxu2  ;;  %v696_v50 = vpop.f32.mrf.mxu3 }
 0x101   : > { %v1225_v51 = vpop.eup %1224  ;;  %v657_v52 = vadd.f32 %v1394_v40, %v656_v49  ;;  %v697_v53 = vadd.f32 %v1394_v40, %v696_v50  ;;  %v579_v54 = vpop.f32.mrf.mxu0 }
 0x102   : > { %v619_v55 = vpop.f32.mrf.mxu1  ;;  %v1227_v56 = vpop.eup %1226  ;;  %815 = vst [vmem:[%s1402_s7 + $0x150] sm:$0xff] %v1225_v51  ;;  %v580_v57 = vadd.f32 %v1394_v40, %v579_v54 }
 0x103   : > { %v620_v58 = vadd.f32 %v1394_v40, %v619_v55  ;;  %v1229_v59 = vpop.eup %1228  ;;  %831 = vst [vmem:[%s1402_s7 + $0x1d0] sm:$0xff] %v1227_v56  ;;  %1232 = vtanh.f32 %v657_v52 }
 0x104   : > { %v1231_v60 = vpop.eup %1230  ;;  %784 = vst [vmem:[%s1402_s7 + $0x58] sm:$0xff] %v1229_v59  ;;  %1234 = vtanh.f32 %v697_v53 }
 0x105   : > { %800 = vst [vmem:[%s1402_s7 + $0xd8] sm:$0xff] %v1231_v60  ;;  %1236 = vtanh.f32 %v580_v57 }
 0x106   : > { %1238 = vtanh.f32 %v620_v58 }
 0x108   : > { %v659_v61 = vpop.f32.mrf.mxu2  ;;  %v699_v62 = vpop.f32.mrf.mxu3 }
 0x109   : > { %v1233_v63 = vpop.eup %1232  ;;  %v660_v0 = vadd.f32 %v1394_v40, %v659_v61  ;;  %v700_v1 = vadd.f32 %v1394_v40, %v699_v62  ;;  %v581_v2 = vpop.f32.mrf.mxu0 }
 0x10a   : > { %v621_v3 = vpop.f32.mrf.mxu1  ;;  %v1235_v4 = vpop.eup %1234  ;;  %816 = vst [vmem:[%s1402_s7 + $0x158] sm:$0xff] %v1233_v63  ;;  %v582_v5 = vadd.f32 %v1394_v40, %v581_v2 }
 0x10b   : > { %v622_v6 = vadd.f32 %v1394_v40, %v621_v3  ;;  %v1237_v7 = vpop.eup %1236  ;;  %832 = vst [vmem:[%s1402_s7 + $0x1d8] sm:$0xff] %v1235_v4  ;;  %1240 = vtanh.f32 %v660_v0 }
 0x10c   : > { %v1239_v8 = vpop.eup %1238  ;;  %785 = vst [vmem:[%s1402_s7 + $0x60] sm:$0xff] %v1237_v7  ;;  %1242 = vtanh.f32 %v700_v1 }
 0x10d   : > { %801 = vst [vmem:[%s1402_s7 + $0xe0] sm:$0xff] %v1239_v8  ;;  %1244 = vtanh.f32 %v582_v5 }
 0x10e   : > { %1246 = vtanh.f32 %v622_v6 }
 0x110   : > { %v661_v9 = vpop.f32.mrf.mxu2  ;;  %v701_v10 = vpop.f32.mrf.mxu3 }
 0x111   : > { %v1241_v11 = vpop.eup %1240  ;;  %v662_v12 = vadd.f32 %v1394_v40, %v661_v9  ;;  %v702_v13 = vadd.f32 %v1394_v40, %v701_v10  ;;  %v584_v14 = vpop.f32.mrf.mxu0 }
 0x112   : > { %v624_v15 = vpop.f32.mrf.mxu1  ;;  %v1243_v16 = vpop.eup %1242  ;;  %817 = vst [vmem:[%s1402_s7 + $0x160] sm:$0xff] %v1241_v11  ;;  %v585_v17 = vadd.f32 %v1394_v40, %v584_v14 }
 0x113   : > { %v625_v18 = vadd.f32 %v1394_v40, %v624_v15  ;;  %v1245_v19 = vpop.eup %1244  ;;  %833 = vst [vmem:[%s1402_s7 + $0x1e0] sm:$0xff] %v1243_v16  ;;  %1248 = vtanh.f32 %v662_v12 }
 0x114   : > { %v1247_v20 = vpop.eup %1246  ;;  %786 = vst [vmem:[%s1402_s7 + $0x68] sm:$0xff] %v1245_v19  ;;  %1250 = vtanh.f32 %v702_v13 }
 0x115   : > { %802 = vst [vmem:[%s1402_s7 + $0xe8] sm:$0xff] %v1247_v20  ;;  %1252 = vtanh.f32 %v585_v17 }
 0x116   : > { %1254 = vtanh.f32 %v625_v18 }
 0x118   : > { %v664_v21 = vpop.f32.mrf.mxu2  ;;  %v704_v22 = vpop.f32.mrf.mxu3 }
 0x119   : > { %v1249_v23 = vpop.eup %1248  ;;  %v665_v24 = vadd.f32 %v1394_v40, %v664_v21  ;;  %v705_v25 = vadd.f32 %v1394_v40, %v704_v22  ;;  %v586_v26 = vpop.f32.mrf.mxu0 }
 0x11a   : > { %v626_v27 = vpop.f32.mrf.mxu1  ;;  %v1251_v28 = vpop.eup %1250  ;;  %818 = vst [vmem:[%s1402_s7 + $0x168] sm:$0xff] %v1249_v23  ;;  %v587_v29 = vadd.f32 %v1394_v40, %v586_v26 }
 0x11b   : > { %v627_v30 = vadd.f32 %v1394_v40, %v626_v27  ;;  %v1253_v31 = vpop.eup %1252  ;;  %834 = vst [vmem:[%s1402_s7 + $0x1e8] sm:$0xff] %v1251_v28  ;;  %1256 = vtanh.f32 %v665_v24 }
 0x11c   : > { %v1255_v32 = vpop.eup %1254  ;;  %787 = vst [vmem:[%s1402_s7 + $0x70] sm:$0xff] %v1253_v31  ;;  %1258 = vtanh.f32 %v705_v25 }
 0x11d   : > { %803 = vst [vmem:[%s1402_s7 + $0xf0] sm:$0xff] %v1255_v32  ;;  %1260 = vtanh.f32 %v587_v29 }
 0x11e   : > { %1262 = vtanh.f32 %v627_v30 }
 0x120   : > { %v666_v33 = vpop.f32.mrf.mxu2  ;;  %v706_v34 = vpop.f32.mrf.mxu3 }
 0x121   : > { %v1257_v35 = vpop.eup %1256  ;;  %v667_v36 = vadd.f32 %v1394_v40, %v666_v33  ;;  %v707_v37 = vadd.f32 %v1394_v40, %v706_v34 }
 0x122   : > { %v1259_v38 = vpop.eup %1258  ;;  %819 = vst [vmem:[%s1402_s7 + $0x170] sm:$0xff] %v1257_v35 }
 0x123   : > { %v1261_v39 = vpop.eup %1260  ;;  %835 = vst [vmem:[%s1402_s7 + $0x1f0] sm:$0xff] %v1259_v38  ;;  %1264 = vtanh.f32 %v667_v36 }
 0x124   : > { %v1263_v41 = vpop.eup %1262  ;;  %788 = vst [vmem:[%s1402_s7 + $0x78] sm:$0xff] %v1261_v39  ;;  %1266 = vtanh.f32 %v707_v37 }
 0x125   : > { %804 = vst [vmem:[%s1402_s7 + $0xf8] sm:$0xff] %v1263_v41 }
 0x129   : > { %v1265_v42 = vpop.eup %1264 }
 0x12a   : > { %v1267_v43 = vpop.eup %1266  ;;  %820 = vst [vmem:[%s1402_s7 + $0x178] sm:$0xff] %v1265_v42 }
 0x12b   : > { %836 = vst [vmem:[%s1402_s7 + $0x1f8] sm:$0xff] %v1267_v43 }
 0x12c PF: > { %s13_s12 = sadd.s32 1, %s1274_s12  }
 0x12d   : > { %p10_p4 = scmp.ge.s32.totalorder %s13_s12, 6  }
 0x12f   :  { %12 = sbr.rel (!%p10_p4) target bundleno = 1 (0x1), region = 62 }

</bundles_post_ra>
